<compile_context>
chip_gen: v7x
topology: tpu7x:2x2x1
jax: 0.10.0
libtpu: 0.0.40
codegen_flags: <defaults>
</compile_context>

<pallas_src>
import math

import jax
import jax.numpy as jnp
from jax import lax
from jax.experimental import pallas as pl
from jax.experimental.pallas import tpu as pltpu

# ----- small, module-consistent hyperparameters -----
S = 8        # target sequence length
SM = 12      # memory (encoder output) sequence length
B = 2        # batch
D = 32       # d_model
H = 4        # n_heads
DH = D // H  # head dim
FF = 64      # dim_feedforward
EPS = 1e-5   # nn.LayerNorm default eps

SEG = 128    # lane-aligned segment width inside the packed weight slab
NSEG = 6     # qkv_self | out_self | q_cross | kv_cross | out_cross | linear1


def _layernorm(x, gamma, beta):
    mu = jnp.mean(x, axis=-1, keepdims=True)
    var = jnp.mean((x - mu) ** 2, axis=-1, keepdims=True)
    return (x - mu) * lax.rsqrt(var + EPS) * gamma + beta


def decoder_layer_kernel(tgt_ref, mem_ref, wpack_ref, w2t_ref, vec_ref, out_ref):
    """One invocation; whole (S, B*D) target and (SM, B*D) memory resident in VMEM."""
    x = tgt_ref[...]                      # (S, B*D)
    mem = mem_ref[...]                    # (SM, B*D)

    # --- packed, pre-transposed weights (lane-aligned segments) ---
    w_qkv_sa = wpack_ref[:, 0 * SEG:0 * SEG + 3 * D]   # (D, 3D)
    w_o_sa   = wpack_ref[:, 1 * SEG:1 * SEG + D]       # (D, D)
    w_q_ca   = wpack_ref[:, 2 * SEG:2 * SEG + D]       # (D, D)
    w_kv_ca  = wpack_ref[:, 3 * SEG:3 * SEG + 2 * D]   # (D, 2D)
    w_o_ca   = wpack_ref[:, 4 * SEG:4 * SEG + D]       # (D, D)
    w_1      = wpack_ref[:, 5 * SEG:5 * SEG + FF]      # (D, FF)
    w_2      = w2t_ref[...]                            # (FF, D)

    # --- packed bias / LayerNorm vectors (one row each, kept 2-D for broadcast) ---
    b_qkv_sa = vec_ref[0:1, :3 * D]
    b_o_sa   = vec_ref[1:2, :D]
    b_q_ca   = vec_ref[2:3, :D]
    b_kv_ca  = vec_ref[3:4, :2 * D]
    b_o_ca   = vec_ref[4:5, :D]
    b_1      = vec_ref[5:6, :FF]
    b_2      = vec_ref[6:7, :D]
    g1, be1 = vec_ref[7:8, :D],   vec_ref[8:9, :D]
    g2, be2 = vec_ref[9:10, :D],  vec_ref[10:11, :D]
    g3, be3 = vec_ref[11:12, :D], vec_ref[12:13, :D]

    scale = 1.0 / math.sqrt(DH)

    def attend(q_list, k_list, v_list):
        # q_list[b]: (Lq, D); k_list[b], v_list[b]: (Lk, D)
        # All B*H (batch, head) groups go through one batched contraction pair and
        # one softmax pass (no per-head matmul/softmax loop).
        qg = jnp.stack([q_list[b][:, h * DH:(h + 1) * DH]
                        for b in range(B) for h in range(H)], axis=0)   # (G, Lq, DH)
        kg = jnp.stack([k_list[b][:, h * DH:(h + 1) * DH]
                        for b in range(B) for h in range(H)], axis=0)   # (G, Lk, DH)
        vg = jnp.stack([v_list[b][:, h * DH:(h + 1) * DH]
                        for b in range(B) for h in range(H)], axis=0)   # (G, Lk, DH)
        s = jnp.einsum("gqd,gkd->gqk", qg, kg,
                       preferred_element_type=jnp.float32) * scale      # (G, Lq, Lk)
        s = s - jnp.max(s, axis=-1, keepdims=True)
        p = jnp.exp(s)
        p = p * pl.reciprocal(jnp.sum(p, axis=-1, keepdims=True), approx=True)
        # TODO(synk): attention dropout skipped (eval-mode identity).
        ctx = jnp.einsum("gqk,gkd->gqd", p, vg,
                         preferred_element_type=jnp.float32)            # (G, Lq, DH)
        return [jnp.concatenate([ctx[b * H + h] for h in range(H)], axis=-1)
                for b in range(B)]                                      # [(Lq, D)] * B

    # per-batch views are static lane slices of the (rows, B*D) layout (no relayout)
    xs = [x[:, b * D:(b + 1) * D] for b in range(B)]     # (S, D)
    ms = [mem[:, b * D:(b + 1) * D] for b in range(B)]   # (SM, D)

    # ---------------- self attention + add & norm1 ----------------
    qkv = [jnp.dot(xs[b], w_qkv_sa, preferred_element_type=jnp.float32) + b_qkv_sa
           for b in range(B)]                                           # (S, 3D)
    ctx1 = attend([t[:, :D] for t in qkv],
                  [t[:, D:2 * D] for t in qkv],
                  [t[:, 2 * D:] for t in qkv])
    y1 = [_layernorm(xs[b]
                     + jnp.dot(ctx1[b], w_o_sa, preferred_element_type=jnp.float32)
                     + b_o_sa, g1, be1)
          for b in range(B)]

    # ---------------- cross attention (memory) + add & norm2 ----------------
    qc = [jnp.dot(y1[b], w_q_ca, preferred_element_type=jnp.float32) + b_q_ca
          for b in range(B)]                                            # (S, D)
    kvc = [jnp.dot(ms[b], w_kv_ca, preferred_element_type=jnp.float32) + b_kv_ca
           for b in range(B)]                                           # (SM, 2D)
    ctx2 = attend(qc, [t[:, :D] for t in kvc], [t[:, D:] for t in kvc])
    y2 = [_layernorm(y1[b]
                     + jnp.dot(ctx2[b], w_o_ca, preferred_element_type=jnp.float32)
                     + b_o_ca, g2, be2)
          for b in range(B)]

    # ---------------- feedforward + add & norm3 ----------------
    y3 = []
    for b in range(B):
        h1 = jnp.maximum(
            jnp.dot(y2[b], w_1, preferred_element_type=jnp.float32) + b_1, 0.0)
        h2 = jnp.dot(h1, w_2, preferred_element_type=jnp.float32) + b_2
        y3.append(_layernorm(y2[b] + h2, g3, be3))

    out_ref[...] = jnp.concatenate(y3, axis=-1)          # (S, B*D) lane-dense store


def decoder_layer_pallas(tgt_sbd, mem_sbd, kernel_params):
    """tgt_sbd: (S, B, D), mem_sbd: (SM, B, D). Returns (S, B, D)."""
    s, b, d = tgt_sbd.shape
    sm = mem_sbd.shape[0]
    # contiguous last-two-dims merge: a free metadata reshape, no transpose / copy
    tgt2d = tgt_sbd.reshape(s, b * d)
    mem2d = mem_sbd.reshape(sm, b * d)

    vmem = pl.BlockSpec(memory_space=pltpu.MemorySpace.VMEM)
    out2d = pl.pallas_call(
        decoder_layer_kernel,
        out_shape=jax.ShapeDtypeStruct((s, b * d), jnp.float32),
        in_specs=[vmem] * 5,
        out_specs=vmem,
    )(tgt2d, mem2d, *kernel_params)
    return out2d.reshape(s, b, d)


# ---------------- parameters (PyTorch layout) + one-time packing ----------------
def init_torch_params(key):
    ks = jax.random.split(key, 12)
    sd = 0.02
    p = {
        "sa_in_w":  jax.random.normal(ks[0], (3 * D, D), jnp.float32) * sd,
        "sa_in_b":  jax.random.normal(ks[1], (3 * D,), jnp.float32) * sd,
        "sa_out_w": jax.random.normal(ks[2], (D, D), jnp.float32) * sd,
        "sa_out_b": jax.random.normal(ks[3], (D,), jnp.float32) * sd,
        "ca_in_w":  jax.random.normal(ks[4], (3 * D, D), jnp.float32) * sd,
        "ca_in_b":  jax.random.normal(ks[5], (3 * D,), jnp.float32) * sd,
        "ca_out_w": jax.random.normal(ks[6], (D, D), jnp.float32) * sd,
        "ca_out_b": jax.random.normal(ks[7], (D,), jnp.float32) * sd,
        "w1": jax.random.normal(ks[8], (FF, D), jnp.float32) * sd,
        "b1": jax.random.normal(ks[9], (FF,), jnp.float32) * sd,
        "w2": jax.random.normal(ks[10], (D, FF), jnp.float32) * sd,
        "b2": jax.random.normal(ks[11], (D,), jnp.float32) * sd,
    }
    for i in (1, 2, 3):
        p[f"g{i}"] = jnp.ones((D,), jnp.float32)
        p[f"be{i}"] = jnp.zeros((D,), jnp.float32)
    return p


def pack_kernel_params(p):
    """Host-side, one-time: pre-transpose weights into one lane-aligned slab and
    pack all bias / LayerNorm vectors into a single (16, 128) array."""
    wpack = jnp.zeros((D, NSEG * SEG), jnp.float32)
    wpack = wpack.at[:, 0 * SEG:0 * SEG + 3 * D].set(p["sa_in_w"].T)
    wpack = wpack.at[:, 1 * SEG:1 * SEG + D].set(p["sa_out_w"].T)
    wpack = wpack.at[:, 2 * SEG:2 * SEG + D].set(p["ca_in_w"][:D].T)
    wpack = wpack.at[:, 3 * SEG:3 * SEG + 2 * D].set(p["ca_in_w"][D:].T)
    wpack = wpack.at[:, 4 * SEG:4 * SEG + D].set(p["ca_out_w"].T)
    wpack = wpack.at[:, 5 * SEG:5 * SEG + FF].set(p["w1"].T)
    w2t = p["w2"].T                                       # (FF, D)

    vecs = jnp.zeros((16, 128), jnp.float32)
    rows = [p["sa_in_b"], p["sa_out_b"], p["ca_in_b"][:D], p["ca_in_b"][D:],
            p["ca_out_b"], p["b1"], p["b2"],
            p["g1"], p["be1"], p["g2"], p["be2"], p["g3"], p["be3"]]
    for i, v in enumerate(rows):
        vecs = vecs.at[i, :v.shape[0]].set(v)
    return (wpack, w2t, vecs)


# ---------------- pure-JAX reference (PyTorch semantics) ----------------
def reference_jax(tgt_sbd, mem_sbd, p):
    tgt = jnp.transpose(tgt_sbd, (1, 0, 2))   # (B, S, D)
    mem = jnp.transpose(mem_sbd, (1, 0, 2))   # (B, SM, D)

    def ln(z, g, bta):
        mu = jnp.mean(z, -1, keepdims=True)
        var = jnp.mean((z - mu) ** 2, -1, keepdims=True)
        return (z - mu) * lax.rsqrt(var + EPS) * g + bta

    def mha(q_in, k_in, v_in, w_in, b_in, w_out, b_out):
        q = q_in @ w_in[:D].T + b_in[:D]
        k = k_in @ w_in[D:2 * D].T + b_in[D:2 * D]
        v = v_in @ w_in[2 * D:].T + b_in[2 * D:]
        lq, lk = q.shape[0], k.shape[0]
        qh = q.reshape(lq, H, DH).transpose(1, 0, 2)
        kh = k.reshape(lk, H, DH).transpose(1, 0, 2)
        vh = v.reshape(lk, H, DH).transpose(1, 0, 2)
        s = jnp.einsum("hqd,hkd->hqk", qh, kh) / math.sqrt(DH)
        prob = jax.nn.softmax(s, axis=-1)
        ctx = jnp.einsum("hqk,hkd->hqd", prob, vh)
        ctx = ctx.transpose(1, 0, 2).reshape(lq, D)
        return ctx @ w_out.T + b_out

    def one(tb, mb):
        a1 = mha(tb, tb, tb, p["sa_in_w"], p["sa_in_b"], p["sa_out_w"], p["sa_out_b"])
        y1 = ln(tb + a1, p["g1"], p["be1"])
        a2 = mha(y1, mb, mb, p["ca_in_w"], p["ca_in_b"], p["ca_out_w"], p["ca_out_b"])
        y2 = ln(y1 + a2, p["g2"], p["be2"])
        h1 = jnp.maximum(y2 @ p["w1"].T + p["b1"], 0.0)
        h2 = h1 @ p["w2"].T + p["b2"]
        return ln(y2 + h2, p["g3"], p["be3"])

    out = jax.vmap(one)(tgt, mem)             # (B, S, D)
    return jnp.transpose(out, (1, 0, 2))


if __name__ == "__main__":
    key = jax.random.PRNGKey(0)
    k_tgt, k_mem, k_par = jax.random.split(key, 3)
    tgt = jax.random.normal(k_tgt, (S, B, D), jnp.float32)      # (seq, batch, d_model)
    memory = jax.random.normal(k_mem, (SM, B, D), jnp.float32)  # encoder memory

    torch_params = init_torch_params(k_par)
    kernel_params = pack_kernel_params(torch_params)

    out = decoder_layer_pallas(tgt, memory, kernel_params)
    out = jax.block_until_ready(out)

    with jax.default_matmul_precision("highest"):
        ref = reference_jax(tgt, memory, torch_params)

    assert out.shape == (S, B, D)
    # tolerance covers MXU f32 matmul passes + approx softmax reciprocal
    assert jnp.allclose(out, ref, atol=1e-3, rtol=1e-3), "mismatch vs reference"

    print("KERNEL_OK")
</pallas_src>

<mosaic_0001>
module attributes {stable_mosaic.version = 11 : i64} {
  func.func @decoder_layer_kernel(%arg0: memref<8x64xf32, #tpu.memory_space<vmem>>, %arg1: memref<12x64xf32, #tpu.memory_space<vmem>>, %arg2: memref<32x768xf32, #tpu.memory_space<vmem>>, %arg3: memref<64x32xf32, #tpu.memory_space<vmem>>, %arg4: memref<16x128xf32, #tpu.memory_space<vmem>>, %arg5: memref<8x64xf32, #tpu.memory_space<vmem>>) attributes {dimension_semantics = [], scalar_prefetch = 0 : i64, scratch_operands = 0 : i64, tpu.core_type = #tpu.core_type<tc>} {
    %c0 = arith.constant 0 : index
    %c0_0 = arith.constant 0 : index
    %0 = vector.load %arg0[%c0, %c0_0] : memref<8x64xf32, #tpu.memory_space<vmem>>, vector<8x64xf32>
    %c0_1 = arith.constant 0 : index
    %c0_2 = arith.constant 0 : index
    %1 = vector.load %arg1[%c0_1, %c0_2] : memref<12x64xf32, #tpu.memory_space<vmem>>, vector<12x64xf32>
    %c0_3 = arith.constant 0 : index
    %c0_4 = arith.constant 0 : index
    %2 = vector.load %arg2[%c0_3, %c0_4] : memref<32x768xf32, #tpu.memory_space<vmem>>, vector<32x96xf32>
    %c0_5 = arith.constant 0 : index
    %c128 = arith.constant 128 : index
    %3 = vector.load %arg2[%c0_5, %c128] : memref<32x768xf32, #tpu.memory_space<vmem>>, vector<32x32xf32>
    %c0_6 = arith.constant 0 : index
    %c256 = arith.constant 256 : index
    %4 = vector.load %arg2[%c0_6, %c256] : memref<32x768xf32, #tpu.memory_space<vmem>>, vector<32x32xf32>
    %c0_7 = arith.constant 0 : index
    %c384 = arith.constant 384 : index
    %5 = vector.load %arg2[%c0_7, %c384] : memref<32x768xf32, #tpu.memory_space<vmem>>, vector<32x64xf32>
    %c0_8 = arith.constant 0 : index
    %c512 = arith.constant 512 : index
    %6 = vector.load %arg2[%c0_8, %c512] : memref<32x768xf32, #tpu.memory_space<vmem>>, vector<32x32xf32>
    %c0_9 = arith.constant 0 : index
    %c640 = arith.constant 640 : index
    %7 = vector.load %arg2[%c0_9, %c640] : memref<32x768xf32, #tpu.memory_space<vmem>>, vector<32x64xf32>
    %c0_10 = arith.constant 0 : index
    %c0_11 = arith.constant 0 : index
    %8 = vector.load %arg3[%c0_10, %c0_11] : memref<64x32xf32, #tpu.memory_space<vmem>>, vector<64x32xf32>
    %c0_12 = arith.constant 0 : index
    %c0_13 = arith.constant 0 : index
    %9 = vector.load %arg4[%c0_12, %c0_13] : memref<16x128xf32, #tpu.memory_space<vmem>>, vector<1x96xf32>
    %c1 = arith.constant 1 : index
    %c0_14 = arith.constant 0 : index
    %10 = vector.load %arg4[%c1, %c0_14] : memref<16x128xf32, #tpu.memory_space<vmem>>, vector<1x32xf32>
    %c2 = arith.constant 2 : index
    %c0_15 = arith.constant 0 : index
    %11 = vector.load %arg4[%c2, %c0_15] : memref<16x128xf32, #tpu.memory_space<vmem>>, vector<1x32xf32>
    %c3 = arith.constant 3 : index
    %c0_16 = arith.constant 0 : index
    %12 = vector.load %arg4[%c3, %c0_16] : memref<16x128xf32, #tpu.memory_space<vmem>>, vector<1x64xf32>
    %c4 = arith.constant 4 : index
    %c0_17 = arith.constant 0 : index
    %13 = vector.load %arg4[%c4, %c0_17] : memref<16x128xf32, #tpu.memory_space<vmem>>, vector<1x32xf32>
    %c5 = arith.constant 5 : index
    %c0_18 = arith.constant 0 : index
    %14 = vector.load %arg4[%c5, %c0_18] : memref<16x128xf32, #tpu.memory_space<vmem>>, vector<1x64xf32>
    %c6 = arith.constant 6 : index
    %c0_19 = arith.constant 0 : index
    %15 = vector.load %arg4[%c6, %c0_19] : memref<16x128xf32, #tpu.memory_space<vmem>>, vector<1x32xf32>
    %c7 = arith.constant 7 : index
    %c0_20 = arith.constant 0 : index
    %16 = vector.load %arg4[%c7, %c0_20] : memref<16x128xf32, #tpu.memory_space<vmem>>, vector<1x32xf32>
    %c8 = arith.constant 8 : index
    %c0_21 = arith.constant 0 : index
    %17 = vector.load %arg4[%c8, %c0_21] : memref<16x128xf32, #tpu.memory_space<vmem>>, vector<1x32xf32>
    %c9 = arith.constant 9 : index
    %c0_22 = arith.constant 0 : index
    %18 = vector.load %arg4[%c9, %c0_22] : memref<16x128xf32, #tpu.memory_space<vmem>>, vector<1x32xf32>
    %c10 = arith.constant 10 : index
    %c0_23 = arith.constant 0 : index
    %19 = vector.load %arg4[%c10, %c0_23] : memref<16x128xf32, #tpu.memory_space<vmem>>, vector<1x32xf32>
    %c11 = arith.constant 11 : index
    %c0_24 = arith.constant 0 : index
    %20 = vector.load %arg4[%c11, %c0_24] : memref<16x128xf32, #tpu.memory_space<vmem>>, vector<1x32xf32>
    %c12 = arith.constant 12 : index
    %c0_25 = arith.constant 0 : index
    %21 = vector.load %arg4[%c12, %c0_25] : memref<16x128xf32, #tpu.memory_space<vmem>>, vector<1x32xf32>
    %22 = vector.extract_strided_slice %0 {offsets = [0, 0], sizes = [8, 32], strides = [1, 1]} : vector<8x64xf32> to vector<8x32xf32>
    %23 = vector.extract_strided_slice %0 {offsets = [0, 32], sizes = [8, 32], strides = [1, 1]} : vector<8x64xf32> to vector<8x32xf32>
    %24 = vector.extract_strided_slice %1 {offsets = [0, 0], sizes = [12, 32], strides = [1, 1]} : vector<12x64xf32> to vector<12x32xf32>
    %25 = vector.extract_strided_slice %1 {offsets = [0, 32], sizes = [12, 32], strides = [1, 1]} : vector<12x64xf32> to vector<12x32xf32>
    %cst = arith.constant dense<0.000000e+00> : vector<8x96xf32>
    %26 = tpu.matmul %22, %2, %cst {dimension_numbers = #tpu.dot_dimension_numbers<[1], [0], [0], [1], [0, 0, 1, 1], [], []>} : vector<8x32xf32>, vector<32x96xf32>, vector<8x96xf32> -> vector<8x96xf32>
    %27 = vector.broadcast %9 : vector<1x96xf32> to vector<8x96xf32>
    %28 = arith.addf %26, %27 : vector<8x96xf32>
    %cst_26 = arith.constant dense<0.000000e+00> : vector<8x96xf32>
    %29 = tpu.matmul %23, %2, %cst_26 {dimension_numbers = #tpu.dot_dimension_numbers<[1], [0], [0], [1], [0, 0, 1, 1], [], []>} : vector<8x32xf32>, vector<32x96xf32>, vector<8x96xf32> -> vector<8x96xf32>
    %30 = vector.broadcast %9 : vector<1x96xf32> to vector<8x96xf32>
    %31 = arith.addf %29, %30 : vector<8x96xf32>
    %32 = vector.extract_strided_slice %28 {offsets = [0, 0], sizes = [8, 32], strides = [1, 1]} : vector<8x96xf32> to vector<8x32xf32>
    %33 = vector.extract_strided_slice %31 {offsets = [0, 0], sizes = [8, 32], strides = [1, 1]} : vector<8x96xf32> to vector<8x32xf32>
    %34 = vector.extract_strided_slice %28 {offsets = [0, 32], sizes = [8, 32], strides = [1, 1]} : vector<8x96xf32> to vector<8x32xf32>
    %35 = vector.extract_strided_slice %31 {offsets = [0, 32], sizes = [8, 32], strides = [1, 1]} : vector<8x96xf32> to vector<8x32xf32>
    %36 = vector.extract_strided_slice %28 {offsets = [0, 64], sizes = [8, 32], strides = [1, 1]} : vector<8x96xf32> to vector<8x32xf32>
    %37 = vector.extract_strided_slice %31 {offsets = [0, 64], sizes = [8, 32], strides = [1, 1]} : vector<8x96xf32> to vector<8x32xf32>
    %38 = vector.extract_strided_slice %32 {offsets = [0, 0], sizes = [8, 8], strides = [1, 1]} : vector<8x32xf32> to vector<8x8xf32>
    %39 = vector.extract_strided_slice %32 {offsets = [0, 8], sizes = [8, 8], strides = [1, 1]} : vector<8x32xf32> to vector<8x8xf32>
    %40 = vector.extract_strided_slice %32 {offsets = [0, 16], sizes = [8, 8], strides = [1, 1]} : vector<8x32xf32> to vector<8x8xf32>
    %41 = vector.extract_strided_slice %32 {offsets = [0, 24], sizes = [8, 8], strides = [1, 1]} : vector<8x32xf32> to vector<8x8xf32>
    %42 = vector.extract_strided_slice %33 {offsets = [0, 0], sizes = [8, 8], strides = [1, 1]} : vector<8x32xf32> to vector<8x8xf32>
    %43 = vector.extract_strided_slice %33 {offsets = [0, 8], sizes = [8, 8], strides = [1, 1]} : vector<8x32xf32> to vector<8x8xf32>
    %44 = vector.extract_strided_slice %33 {offsets = [0, 16], sizes = [8, 8], strides = [1, 1]} : vector<8x32xf32> to vector<8x8xf32>
    %45 = vector.extract_strided_slice %33 {offsets = [0, 24], sizes = [8, 8], strides = [1, 1]} : vector<8x32xf32> to vector<8x8xf32>
    %46 = vector.shape_cast %38 : vector<8x8xf32> to vector<1x8x8xf32>
    %47 = vector.shape_cast %39 : vector<8x8xf32> to vector<1x8x8xf32>
    %48 = vector.shape_cast %40 : vector<8x8xf32> to vector<1x8x8xf32>
    %49 = vector.shape_cast %41 : vector<8x8xf32> to vector<1x8x8xf32>
    %50 = vector.shape_cast %42 : vector<8x8xf32> to vector<1x8x8xf32>
    %51 = vector.shape_cast %43 : vector<8x8xf32> to vector<1x8x8xf32>
    %52 = vector.shape_cast %44 : vector<8x8xf32> to vector<1x8x8xf32>
    %53 = vector.shape_cast %45 : vector<8x8xf32> to vector<1x8x8xf32>
    %54 = tpu.concatenate %46, %47, %48, %49, %50, %51, %52, %53 in 0 : vector<1x8x8xf32>, vector<1x8x8xf32>, vector<1x8x8xf32>, vector<1x8x8xf32>, vector<1x8x8xf32>, vector<1x8x8xf32>, vector<1x8x8xf32>, vector<1x8x8xf32> -> vector<8x8x8xf32>
    %55 = vector.extract_strided_slice %34 {offsets = [0, 0], sizes = [8, 8], strides = [1, 1]} : vector<8x32xf32> to vector<8x8xf32>
    %56 = vector.extract_strided_slice %34 {offsets = [0, 8], sizes = [8, 8], strides = [1, 1]} : vector<8x32xf32> to vector<8x8xf32>
    %57 = vector.extract_strided_slice %34 {offsets = [0, 16], sizes = [8, 8], strides = [1, 1]} : vector<8x32xf32> to vector<8x8xf32>
    %58 = vector.extract_strided_slice %34 {offsets = [0, 24], sizes = [8, 8], strides = [1, 1]} : vector<8x32xf32> to vector<8x8xf32>
    %59 = vector.extract_strided_slice %35 {offsets = [0, 0], sizes = [8, 8], strides = [1, 1]} : vector<8x32xf32> to vector<8x8xf32>
    %60 = vector.extract_strided_slice %35 {offsets = [0, 8], sizes = [8, 8], strides = [1, 1]} : vector<8x32xf32> to vector<8x8xf32>
    %61 = vector.extract_strided_slice %35 {offsets = [0, 16], sizes = [8, 8], strides = [1, 1]} : vector<8x32xf32> to vector<8x8xf32>
    %62 = vector.extract_strided_slice %35 {offsets = [0, 24], sizes = [8, 8], strides = [1, 1]} : vector<8x32xf32> to vector<8x8xf32>
    %63 = vector.shape_cast %55 : vector<8x8xf32> to vector<1x8x8xf32>
    %64 = vector.shape_cast %56 : vector<8x8xf32> to vector<1x8x8xf32>
    %65 = vector.shape_cast %57 : vector<8x8xf32> to vector<1x8x8xf32>
    %66 = vector.shape_cast %58 : vector<8x8xf32> to vector<1x8x8xf32>
    %67 = vector.shape_cast %59 : vector<8x8xf32> to vector<1x8x8xf32>
    %68 = vector.shape_cast %60 : vector<8x8xf32> to vector<1x8x8xf32>
    %69 = vector.shape_cast %61 : vector<8x8xf32> to vector<1x8x8xf32>
    %70 = vector.shape_cast %62 : vector<8x8xf32> to vector<1x8x8xf32>
    %71 = tpu.concatenate %63, %64, %65, %66, %67, %68, %69, %70 in 0 : vector<1x8x8xf32>, vector<1x8x8xf32>, vector<1x8x8xf32>, vector<1x8x8xf32>, vector<1x8x8xf32>, vector<1x8x8xf32>, vector<1x8x8xf32>, vector<1x8x8xf32> -> vector<8x8x8xf32>
    %72 = vector.extract_strided_slice %36 {offsets = [0, 0], sizes = [8, 8], strides = [1, 1]} : vector<8x32xf32> to vector<8x8xf32>
    %73 = vector.extract_strided_slice %36 {offsets = [0, 8], sizes = [8, 8], strides = [1, 1]} : vector<8x32xf32> to vector<8x8xf32>
    %74 = vector.extract_strided_slice %36 {offsets = [0, 16], sizes = [8, 8], strides = [1, 1]} : vector<8x32xf32> to vector<8x8xf32>
    %75 = vector.extract_strided_slice %36 {offsets = [0, 24], sizes = [8, 8], strides = [1, 1]} : vector<8x32xf32> to vector<8x8xf32>
    %76 = vector.extract_strided_slice %37 {offsets = [0, 0], sizes = [8, 8], strides = [1, 1]} : vector<8x32xf32> to vector<8x8xf32>
    %77 = vector.extract_strided_slice %37 {offsets = [0, 8], sizes = [8, 8], strides = [1, 1]} : vector<8x32xf32> to vector<8x8xf32>
    %78 = vector.extract_strided_slice %37 {offsets = [0, 16], sizes = [8, 8], strides = [1, 1]} : vector<8x32xf32> to vector<8x8xf32>
    %79 = vector.extract_strided_slice %37 {offsets = [0, 24], sizes = [8, 8], strides = [1, 1]} : vector<8x32xf32> to vector<8x8xf32>
    %80 = vector.shape_cast %72 : vector<8x8xf32> to vector<1x8x8xf32>
    %81 = vector.shape_cast %73 : vector<8x8xf32> to vector<1x8x8xf32>
    %82 = vector.shape_cast %74 : vector<8x8xf32> to vector<1x8x8xf32>
    %83 = vector.shape_cast %75 : vector<8x8xf32> to vector<1x8x8xf32>
    %84 = vector.shape_cast %76 : vector<8x8xf32> to vector<1x8x8xf32>
    %85 = vector.shape_cast %77 : vector<8x8xf32> to vector<1x8x8xf32>
    %86 = vector.shape_cast %78 : vector<8x8xf32> to vector<1x8x8xf32>
    %87 = vector.shape_cast %79 : vector<8x8xf32> to vector<1x8x8xf32>
    %88 = tpu.concatenate %80, %81, %82, %83, %84, %85, %86, %87 in 0 : vector<1x8x8xf32>, vector<1x8x8xf32>, vector<1x8x8xf32>, vector<1x8x8xf32>, vector<1x8x8xf32>, vector<1x8x8xf32>, vector<1x8x8xf32>, vector<1x8x8xf32> -> vector<8x8x8xf32>
    "tpu.trace_start"() <{level = 10 : i32, message = "gqd,gkd->gqk"}> : () -> ()
    %cst_27 = arith.constant dense<0.000000e+00> : vector<8x8x8xf32>
    %89 = tpu.matmul %54, %71, %cst_27 {dimension_numbers = #tpu.dot_dimension_numbers<[2], [2], [1], [1], [0, 0, 0, 1, 1, 1], [0], [0]>} : vector<8x8x8xf32>, vector<8x8x8xf32>, vector<8x8x8xf32> -> vector<8x8x8xf32>
    "tpu.trace_stop"() : () -> ()
    %cst_28 = arith.constant 0.353553385 : f32
    %90 = vector.broadcast %cst_28 : f32 to vector<8x8x8xf32>
    %91 = arith.mulf %89, %90 : vector<8x8x8xf32>
    %cst_29 = arith.constant dense<0xFF800000> : vector<8x8xf32>
    %92 = vector.multi_reduction <maximumf>, %91, %cst_29 [2] : vector<8x8x8xf32> to vector<8x8xf32>
    %93 = vector.shape_cast %92 : vector<8x8xf32> to vector<8x8x1xf32>
    %94 = vector.broadcast %93 : vector<8x8x1xf32> to vector<8x8x8xf32>
    %95 = arith.subf %91, %94 : vector<8x8x8xf32>
    %96 = math.exp %95 : vector<8x8x8xf32>
    %cst_30 = arith.constant dense<0.000000e+00> : vector<8x8xf32>
    %97 = vector.multi_reduction <add>, %96, %cst_30 [2] : vector<8x8x8xf32> to vector<8x8xf32>
    %98 = vector.shape_cast %97 : vector<8x8xf32> to vector<8x8x1xf32>
    %99 = tpu.reciprocal %98 {approx = true} : vector<8x8x1xf32> -> vector<8x8x1xf32>
    %100 = vector.broadcast %99 : vector<8x8x1xf32> to vector<8x8x8xf32>
    %101 = arith.mulf %96, %100 : vector<8x8x8xf32>
    "tpu.trace_start"() <{level = 10 : i32, message = "gqk,gkd->gqd"}> : () -> ()
    %cst_31 = arith.constant dense<0.000000e+00> : vector<8x8x8xf32>
    %102 = tpu.matmul %101, %88, %cst_31 {dimension_numbers = #tpu.dot_dimension_numbers<[2], [1], [1], [2], [0, 0, 0, 1, 1, 2], [0], [0]>} : vector<8x8x8xf32>, vector<8x8x8xf32>, vector<8x8x8xf32> -> vector<8x8x8xf32>
    "tpu.trace_stop"() : () -> ()
    %103 = vector.extract_strided_slice %102 {offsets = [0, 0, 0], sizes = [1, 8, 8], strides = [1, 1, 1]} : vector<8x8x8xf32> to vector<1x8x8xf32>
    %104 = vector.shape_cast %103 : vector<1x8x8xf32> to vector<8x8xf32>
    %105 = vector.extract_strided_slice %102 {offsets = [1, 0, 0], sizes = [1, 8, 8], strides = [1, 1, 1]} : vector<8x8x8xf32> to vector<1x8x8xf32>
    %106 = vector.shape_cast %105 : vector<1x8x8xf32> to vector<8x8xf32>
    %107 = vector.extract_strided_slice %102 {offsets = [2, 0, 0], sizes = [1, 8, 8], strides = [1, 1, 1]} : vector<8x8x8xf32> to vector<1x8x8xf32>
    %108 = vector.shape_cast %107 : vector<1x8x8xf32> to vector<8x8xf32>
    %109 = vector.extract_strided_slice %102 {offsets = [3, 0, 0], sizes = [1, 8, 8], strides = [1, 1, 1]} : vector<8x8x8xf32> to vector<1x8x8xf32>
    %110 = vector.shape_cast %109 : vector<1x8x8xf32> to vector<8x8xf32>
    %111 = tpu.concatenate %104, %106, %108, %110 in 1 : vector<8x8xf32>, vector<8x8xf32>, vector<8x8xf32>, vector<8x8xf32> -> vector<8x32xf32>
    %112 = vector.extract_strided_slice %102 {offsets = [4, 0, 0], sizes = [1, 8, 8], strides = [1, 1, 1]} : vector<8x8x8xf32> to vector<1x8x8xf32>
    %113 = vector.shape_cast %112 : vector<1x8x8xf32> to vector<8x8xf32>
    %114 = vector.extract_strided_slice %102 {offsets = [5, 0, 0], sizes = [1, 8, 8], strides = [1, 1, 1]} : vector<8x8x8xf32> to vector<1x8x8xf32>
    %115 = vector.shape_cast %114 : vector<1x8x8xf32> to vector<8x8xf32>
    %116 = vector.extract_strided_slice %102 {offsets = [6, 0, 0], sizes = [1, 8, 8], strides = [1, 1, 1]} : vector<8x8x8xf32> to vector<1x8x8xf32>
    %117 = vector.shape_cast %116 : vector<1x8x8xf32> to vector<8x8xf32>
    %118 = vector.extract_strided_slice %102 {offsets = [7, 0, 0], sizes = [1, 8, 8], strides = [1, 1, 1]} : vector<8x8x8xf32> to vector<1x8x8xf32>
    %119 = vector.shape_cast %118 : vector<1x8x8xf32> to vector<8x8xf32>
    %120 = tpu.concatenate %113, %115, %117, %119 in 1 : vector<8x8xf32>, vector<8x8xf32>, vector<8x8xf32>, vector<8x8xf32> -> vector<8x32xf32>
    %cst_32 = arith.constant dense<0.000000e+00> : vector<8x32xf32>
    %121 = tpu.matmul %111, %3, %cst_32 {dimension_numbers = #tpu.dot_dimension_numbers<[1], [0], [0], [1], [0, 0, 1, 1], [], []>} : vector<8x32xf32>, vector<32x32xf32>, vector<8x32xf32> -> vector<8x32xf32>
    %122 = arith.addf %22, %121 : vector<8x32xf32>
    %123 = vector.broadcast %10 : vector<1x32xf32> to vector<8x32xf32>
    %124 = arith.addf %122, %123 : vector<8x32xf32>
    %cst_33 = arith.constant dense<0.000000e+00> : vector<8xf32>
    %125 = vector.multi_reduction <add>, %124, %cst_33 [1] : vector<8x32xf32> to vector<8xf32>
    %126 = vector.shape_cast %125 : vector<8xf32> to vector<8x1xf32>
    %cst_34 = arith.constant 3.200000e+01 : f32
    %127 = vector.broadcast %cst_34 : f32 to vector<8x1xf32>
    %128 = arith.divf %126, %127 : vector<8x1xf32>
    %129 = vector.broadcast %128 : vector<8x1xf32> to vector<8x32xf32>
    %130 = arith.subf %124, %129 : vector<8x32xf32>
    %131 = arith.mulf %130, %130 : vector<8x32xf32>
    %cst_35 = arith.constant dense<0.000000e+00> : vector<8xf32>
    %132 = vector.multi_reduction <add>, %131, %cst_35 [1] : vector<8x32xf32> to vector<8xf32>
    %133 = vector.shape_cast %132 : vector<8xf32> to vector<8x1xf32>
    %cst_36 = arith.constant 3.200000e+01 : f32
    %134 = vector.broadcast %cst_36 : f32 to vector<8x1xf32>
    %135 = arith.divf %133, %134 : vector<8x1xf32>
    %136 = vector.broadcast %128 : vector<8x1xf32> to vector<8x32xf32>
    %137 = arith.subf %124, %136 : vector<8x32xf32>
    %cst_37 = arith.constant 9.99999974E-6 : f32
    %138 = vector.broadcast %cst_37 : f32 to vector<8x1xf32>
    %139 = arith.addf %135, %138 : vector<8x1xf32>
    %140 = math.rsqrt %139 : vector<8x1xf32>
    %141 = vector.broadcast %140 : vector<8x1xf32> to vector<8x32xf32>
    %142 = arith.mulf %137, %141 : vector<8x32xf32>
    %143 = vector.broadcast %16 : vector<1x32xf32> to vector<8x32xf32>
    %144 = arith.mulf %142, %143 : vector<8x32xf32>
    %145 = vector.broadcast %17 : vector<1x32xf32> to vector<8x32xf32>
    %146 = arith.addf %144, %145 : vector<8x32xf32>
    %cst_38 = arith.constant dense<0.000000e+00> : vector<8x32xf32>
    %147 = tpu.matmul %120, %3, %cst_38 {dimension_numbers = #tpu.dot_dimension_numbers<[1], [0], [0], [1], [0, 0, 1, 1], [], []>} : vector<8x32xf32>, vector<32x32xf32>, vector<8x32xf32> -> vector<8x32xf32>
    %148 = arith.addf %23, %147 : vector<8x32xf32>
    %149 = vector.broadcast %10 : vector<1x32xf32> to vector<8x32xf32>
    %150 = arith.addf %148, %149 : vector<8x32xf32>
    %cst_39 = arith.constant dense<0.000000e+00> : vector<8xf32>
    %151 = vector.multi_reduction <add>, %150, %cst_39 [1] : vector<8x32xf32> to vector<8xf32>
    %152 = vector.shape_cast %151 : vector<8xf32> to vector<8x1xf32>
    %cst_40 = arith.constant 3.200000e+01 : f32
    %153 = vector.broadcast %cst_40 : f32 to vector<8x1xf32>
    %154 = arith.divf %152, %153 : vector<8x1xf32>
    %155 = vector.broadcast %154 : vector<8x1xf32> to vector<8x32xf32>
    %156 = arith.subf %150, %155 : vector<8x32xf32>
    %157 = arith.mulf %156, %156 : vector<8x32xf32>
    %cst_41 = arith.constant dense<0.000000e+00> : vector<8xf32>
    %158 = vector.multi_reduction <add>, %157, %cst_41 [1] : vector<8x32xf32> to vector<8xf32>
    %159 = vector.shape_cast %158 : vector<8xf32> to vector<8x1xf32>
    %cst_42 = arith.constant 3.200000e+01 : f32
    %160 = vector.broadcast %cst_42 : f32 to vector<8x1xf32>
    %161 = arith.divf %159, %160 : vector<8x1xf32>
    %162 = vector.broadcast %154 : vector<8x1xf32> to vector<8x32xf32>
    %163 = arith.subf %150, %162 : vector<8x32xf32>
    %cst_43 = arith.constant 9.99999974E-6 : f32
    %164 = vector.broadcast %cst_43 : f32 to vector<8x1xf32>
    %165 = arith.addf %161, %164 : vector<8x1xf32>
    %166 = math.rsqrt %165 : vector<8x1xf32>
    %167 = vector.broadcast %166 : vector<8x1xf32> to vector<8x32xf32>
    %168 = arith.mulf %163, %167 : vector<8x32xf32>
    %169 = vector.broadcast %16 : vector<1x32xf32> to vector<8x32xf32>
    %170 = arith.mulf %168, %169 : vector<8x32xf32>
    %171 = vector.broadcast %17 : vector<1x32xf32> to vector<8x32xf32>
    %172 = arith.addf %170, %171 : vector<8x32xf32>
    %cst_44 = arith.constant dense<0.000000e+00> : vector<8x32xf32>
    %173 = tpu.matmul %146, %4, %cst_44 {dimension_numbers = #tpu.dot_dimension_numbers<[1], [0], [0], [1], [0, 0, 1, 1], [], []>} : vector<8x32xf32>, vector<32x32xf32>, vector<8x32xf32> -> vector<8x32xf32>
    %174 = vector.broadcast %11 : vector<1x32xf32> to vector<8x32xf32>
    %175 = arith.addf %173, %174 : vector<8x32xf32>
    %cst_45 = arith.constant dense<0.000000e+00> : vector<8x32xf32>
    %176 = tpu.matmul %172, %4, %cst_45 {dimension_numbers = #tpu.dot_dimension_numbers<[1], [0], [0], [1], [0, 0, 1, 1], [], []>} : vector<8x32xf32>, vector<32x32xf32>, vector<8x32xf32> -> vector<8x32xf32>
    %177 = vector.broadcast %11 : vector<1x32xf32> to vector<8x32xf32>
    %178 = arith.addf %176, %177 : vector<8x32xf32>
    %cst_46 = arith.constant dense<0.000000e+00> : vector<12x64xf32>
    %179 = tpu.matmul %24, %5, %cst_46 {dimension_numbers = #tpu.dot_dimension_numbers<[1], [0], [0], [1], [0, 0, 1, 1], [], []>} : vector<12x32xf32>, vector<32x64xf32>, vector<12x64xf32> -> vector<12x64xf32>
    %180 = vector.broadcast %12 : vector<1x64xf32> to vector<12x64xf32>
    %181 = arith.addf %179, %180 : vector<12x64xf32>
    %cst_47 = arith.constant dense<0.000000e+00> : vector<12x64xf32>
    %182 = tpu.matmul %25, %5, %cst_47 {dimension_numbers = #tpu.dot_dimension_numbers<[1], [0], [0], [1], [0, 0, 1, 1], [], []>} : vector<12x32xf32>, vector<32x64xf32>, vector<12x64xf32> -> vector<12x64xf32>
    %183 = vector.broadcast %12 : vector<1x64xf32> to vector<12x64xf32>
    %184 = arith.addf %182, %183 : vector<12x64xf32>
    %185 = vector.extract_strided_slice %181 {offsets = [0, 0], sizes = [12, 32], strides = [1, 1]} : vector<12x64xf32> to vector<12x32xf32>
    %186 = vector.extract_strided_slice %184 {offsets = [0, 0], sizes = [12, 32], strides = [1, 1]} : vector<12x64xf32> to vector<12x32xf32>
    %187 = vector.extract_strided_slice %181 {offsets = [0, 32], sizes = [12, 32], strides = [1, 1]} : vector<12x64xf32> to vector<12x32xf32>
    %188 = vector.extract_strided_slice %184 {offsets = [0, 32], sizes = [12, 32], strides = [1, 1]} : vector<12x64xf32> to vector<12x32xf32>
    %189 = vector.extract_strided_slice %175 {offsets = [0, 0], sizes = [8, 8], strides = [1, 1]} : vector<8x32xf32> to vector<8x8xf32>
    %190 = vector.extract_strided_slice %175 {offsets = [0, 8], sizes = [8, 8], strides = [1, 1]} : vector<8x32xf32> to vector<8x8xf32>
    %191 = vector.extract_strided_slice %175 {offsets = [0, 16], sizes = [8, 8], strides = [1, 1]} : vector<8x32xf32> to vector<8x8xf32>
    %192 = vector.extract_strided_slice %175 {offsets = [0, 24], sizes = [8, 8], strides = [1, 1]} : vector<8x32xf32> to vector<8x8xf32>
    %193 = vector.extract_strided_slice %178 {offsets = [0, 0], sizes = [8, 8], strides = [1, 1]} : vector<8x32xf32> to vector<8x8xf32>
    %194 = vector.extract_strided_slice %178 {offsets = [0, 8], sizes = [8, 8], strides = [1, 1]} : vector<8x32xf32> to vector<8x8xf32>
    %195 = vector.extract_strided_slice %178 {offsets = [0, 16], sizes = [8, 8], strides = [1, 1]} : vector<8x32xf32> to vector<8x8xf32>
    %196 = vector.extract_strided_slice %178 {offsets = [0, 24], sizes = [8, 8], strides = [1, 1]} : vector<8x32xf32> to vector<8x8xf32>
    %197 = vector.shape_cast %189 : vector<8x8xf32> to vector<1x8x8xf32>
    %198 = vector.shape_cast %190 : vector<8x8xf32> to vector<1x8x8xf32>
    %199 = vector.shape_cast %191 : vector<8x8xf32> to vector<1x8x8xf32>
    %200 = vector.shape_cast %192 : vector<8x8xf32> to vector<1x8x8xf32>
    %201 = vector.shape_cast %193 : vector<8x8xf32> to vector<1x8x8xf32>
    %202 = vector.shape_cast %194 : vector<8x8xf32> to vector<1x8x8xf32>
    %203 = vector.shape_cast %195 : vector<8x8xf32> to vector<1x8x8xf32>
    %204 = vector.shape_cast %196 : vector<8x8xf32> to vector<1x8x8xf32>
    %205 = tpu.concatenate %197, %198, %199, %200, %201, %202, %203, %204 in 0 : vector<1x8x8xf32>, vector<1x8x8xf32>, vector<1x8x8xf32>, vector<1x8x8xf32>, vector<1x8x8xf32>, vector<1x8x8xf32>, vector<1x8x8xf32>, vector<1x8x8xf32> -> vector<8x8x8xf32>
    %206 = vector.extract_strided_slice %185 {offsets = [0, 0], sizes = [12, 8], strides = [1, 1]} : vector<12x32xf32> to vector<12x8xf32>
    %207 = vector.extract_strided_slice %185 {offsets = [0, 8], sizes = [12, 8], strides = [1, 1]} : vector<12x32xf32> to vector<12x8xf32>
    %208 = vector.extract_strided_slice %185 {offsets = [0, 16], sizes = [12, 8], strides = [1, 1]} : vector<12x32xf32> to vector<12x8xf32>
    %209 = vector.extract_strided_slice %185 {offsets = [0, 24], sizes = [12, 8], strides = [1, 1]} : vector<12x32xf32> to vector<12x8xf32>
    %210 = vector.extract_strided_slice %186 {offsets = [0, 0], sizes = [12, 8], strides = [1, 1]} : vector<12x32xf32> to vector<12x8xf32>
    %211 = vector.extract_strided_slice %186 {offsets = [0, 8], sizes = [12, 8], strides = [1, 1]} : vector<12x32xf32> to vector<12x8xf32>
    %212 = vector.extract_strided_slice %186 {offsets = [0, 16], sizes = [12, 8], strides = [1, 1]} : vector<12x32xf32> to vector<12x8xf32>
    %213 = vector.extract_strided_slice %186 {offsets = [0, 24], sizes = [12, 8], strides = [1, 1]} : vector<12x32xf32> to vector<12x8xf32>
    %214 = vector.shape_cast %206 : vector<12x8xf32> to vector<1x12x8xf32>
    %215 = vector.shape_cast %207 : vector<12x8xf32> to vector<1x12x8xf32>
    %216 = vector.shape_cast %208 : vector<12x8xf32> to vector<1x12x8xf32>
    %217 = vector.shape_cast %209 : vector<12x8xf32> to vector<1x12x8xf32>
    %218 = vector.shape_cast %210 : vector<12x8xf32> to vector<1x12x8xf32>
    %219 = vector.shape_cast %211 : vector<12x8xf32> to vector<1x12x8xf32>
    %220 = vector.shape_cast %212 : vector<12x8xf32> to vector<1x12x8xf32>
    %221 = vector.shape_cast %213 : vector<12x8xf32> to vector<1x12x8xf32>
    %222 = tpu.concatenate %214, %215, %216, %217, %218, %219, %220, %221 in 0 : vector<1x12x8xf32>, vector<1x12x8xf32>, vector<1x12x8xf32>, vector<1x12x8xf32>, vector<1x12x8xf32>, vector<1x12x8xf32>, vector<1x12x8xf32>, vector<1x12x8xf32> -> vector<8x12x8xf32>
    %223 = vector.extract_strided_slice %187 {offsets = [0, 0], sizes = [12, 8], strides = [1, 1]} : vector<12x32xf32> to vector<12x8xf32>
    %224 = vector.extract_strided_slice %187 {offsets = [0, 8], sizes = [12, 8], strides = [1, 1]} : vector<12x32xf32> to vector<12x8xf32>
    %225 = vector.extract_strided_slice %187 {offsets = [0, 16], sizes = [12, 8], strides = [1, 1]} : vector<12x32xf32> to vector<12x8xf32>
    %226 = vector.extract_strided_slice %187 {offsets = [0, 24], sizes = [12, 8], strides = [1, 1]} : vector<12x32xf32> to vector<12x8xf32>
    %227 = vector.extract_strided_slice %188 {offsets = [0, 0], sizes = [12, 8], strides = [1, 1]} : vector<12x32xf32> to vector<12x8xf32>
    %228 = vector.extract_strided_slice %188 {offsets = [0, 8], sizes = [12, 8], strides = [1, 1]} : vector<12x32xf32> to vector<12x8xf32>
    %229 = vector.extract_strided_slice %188 {offsets = [0, 16], sizes = [12, 8], strides = [1, 1]} : vector<12x32xf32> to vector<12x8xf32>
    %230 = vector.extract_strided_slice %188 {offsets = [0, 24], sizes = [12, 8], strides = [1, 1]} : vector<12x32xf32> to vector<12x8xf32>
    %231 = vector.shape_cast %223 : vector<12x8xf32> to vector<1x12x8xf32>
    %232 = vector.shape_cast %224 : vector<12x8xf32> to vector<1x12x8xf32>
    %233 = vector.shape_cast %225 : vector<12x8xf32> to vector<1x12x8xf32>
    %234 = vector.shape_cast %226 : vector<12x8xf32> to vector<1x12x8xf32>
    %235 = vector.shape_cast %227 : vector<12x8xf32> to vector<1x12x8xf32>
    %236 = vector.shape_cast %228 : vector<12x8xf32> to vector<1x12x8xf32>
    %237 = vector.shape_cast %229 : vector<12x8xf32> to vector<1x12x8xf32>
    %238 = vector.shape_cast %230 : vector<12x8xf32> to vector<1x12x8xf32>
    %239 = tpu.concatenate %231, %232, %233, %234, %235, %236, %237, %238 in 0 : vector<1x12x8xf32>, vector<1x12x8xf32>, vector<1x12x8xf32>, vector<1x12x8xf32>, vector<1x12x8xf32>, vector<1x12x8xf32>, vector<1x12x8xf32>, vector<1x12x8xf32> -> vector<8x12x8xf32>
    "tpu.trace_start"() <{level = 10 : i32, message = "gqd,gkd->gqk"}> : () -> ()
    %cst_48 = arith.constant dense<0.000000e+00> : vector<8x8x12xf32>
    %240 = tpu.matmul %205, %222, %cst_48 {dimension_numbers = #tpu.dot_dimension_numbers<[2], [2], [1], [1], [0, 0, 0, 1, 1, 1], [0], [0]>} : vector<8x8x8xf32>, vector<8x12x8xf32>, vector<8x8x12xf32> -> vector<8x8x12xf32>
    "tpu.trace_stop"() : () -> ()
    %cst_49 = arith.constant 0.353553385 : f32
    %241 = vector.broadcast %cst_49 : f32 to vector<8x8x12xf32>
    %242 = arith.mulf %240, %241 : vector<8x8x12xf32>
    %cst_50 = arith.constant dense<0xFF800000> : vector<8x8xf32>
    %243 = vector.multi_reduction <maximumf>, %242, %cst_50 [2] : vector<8x8x12xf32> to vector<8x8xf32>
    %244 = vector.shape_cast %243 : vector<8x8xf32> to vector<8x8x1xf32>
    %245 = vector.broadcast %244 : vector<8x8x1xf32> to vector<8x8x12xf32>
    %246 = arith.subf %242, %245 : vector<8x8x12xf32>
    %247 = math.exp %246 : vector<8x8x12xf32>
    %cst_51 = arith.constant dense<0.000000e+00> : vector<8x8xf32>
    %248 = vector.multi_reduction <add>, %247, %cst_51 [2] : vector<8x8x12xf32> to vector<8x8xf32>
    %249 = vector.shape_cast %248 : vector<8x8xf32> to vector<8x8x1xf32>
    %250 = tpu.reciprocal %249 {approx = true} : vector<8x8x1xf32> -> vector<8x8x1xf32>
    %251 = vector.broadcast %250 : vector<8x8x1xf32> to vector<8x8x12xf32>
    %252 = arith.mulf %247, %251 : vector<8x8x12xf32>
    "tpu.trace_start"() <{level = 10 : i32, message = "gqk,gkd->gqd"}> : () -> ()
    %cst_52 = arith.constant dense<0.000000e+00> : vector<8x8x8xf32>
    %253 = tpu.matmul %252, %239, %cst_52 {dimension_numbers = #tpu.dot_dimension_numbers<[2], [1], [1], [2], [0, 0, 0, 1, 1, 2], [0], [0]>} : vector<8x8x12xf32>, vector<8x12x8xf32>, vector<8x8x8xf32> -> vector<8x8x8xf32>
    "tpu.trace_stop"() : () -> ()
    %254 = vector.extract_strided_slice %253 {offsets = [0, 0, 0], sizes = [1, 8, 8], strides = [1, 1, 1]} : vector<8x8x8xf32> to vector<1x8x8xf32>
    %255 = vector.shape_cast %254 : vector<1x8x8xf32> to vector<8x8xf32>
    %256 = vector.extract_strided_slice %253 {offsets = [1, 0, 0], sizes = [1, 8, 8], strides = [1, 1, 1]} : vector<8x8x8xf32> to vector<1x8x8xf32>
    %257 = vector.shape_cast %256 : vector<1x8x8xf32> to vector<8x8xf32>
    %258 = vector.extract_strided_slice %253 {offsets = [2, 0, 0], sizes = [1, 8, 8], strides = [1, 1, 1]} : vector<8x8x8xf32> to vector<1x8x8xf32>
    %259 = vector.shape_cast %258 : vector<1x8x8xf32> to vector<8x8xf32>
    %260 = vector.extract_strided_slice %253 {offsets = [3, 0, 0], sizes = [1, 8, 8], strides = [1, 1, 1]} : vector<8x8x8xf32> to vector<1x8x8xf32>
    %261 = vector.shape_cast %260 : vector<1x8x8xf32> to vector<8x8xf32>
    %262 = tpu.concatenate %255, %257, %259, %261 in 1 : vector<8x8xf32>, vector<8x8xf32>, vector<8x8xf32>, vector<8x8xf32> -> vector<8x32xf32>
    %263 = vector.extract_strided_slice %253 {offsets = [4, 0, 0], sizes = [1, 8, 8], strides = [1, 1, 1]} : vector<8x8x8xf32> to vector<1x8x8xf32>
    %264 = vector.shape_cast %263 : vector<1x8x8xf32> to vector<8x8xf32>
    %265 = vector.extract_strided_slice %253 {offsets = [5, 0, 0], sizes = [1, 8, 8], strides = [1, 1, 1]} : vector<8x8x8xf32> to vector<1x8x8xf32>
    %266 = vector.shape_cast %265 : vector<1x8x8xf32> to vector<8x8xf32>
    %267 = vector.extract_strided_slice %253 {offsets = [6, 0, 0], sizes = [1, 8, 8], strides = [1, 1, 1]} : vector<8x8x8xf32> to vector<1x8x8xf32>
    %268 = vector.shape_cast %267 : vector<1x8x8xf32> to vector<8x8xf32>
    %269 = vector.extract_strided_slice %253 {offsets = [7, 0, 0], sizes = [1, 8, 8], strides = [1, 1, 1]} : vector<8x8x8xf32> to vector<1x8x8xf32>
    %270 = vector.shape_cast %269 : vector<1x8x8xf32> to vector<8x8xf32>
    %271 = tpu.concatenate %264, %266, %268, %270 in 1 : vector<8x8xf32>, vector<8x8xf32>, vector<8x8xf32>, vector<8x8xf32> -> vector<8x32xf32>
    %cst_53 = arith.constant dense<0.000000e+00> : vector<8x32xf32>
    %272 = tpu.matmul %262, %6, %cst_53 {dimension_numbers = #tpu.dot_dimension_numbers<[1], [0], [0], [1], [0, 0, 1, 1], [], []>} : vector<8x32xf32>, vector<32x32xf32>, vector<8x32xf32> -> vector<8x32xf32>
    %273 = arith.addf %146, %272 : vector<8x32xf32>
    %274 = vector.broadcast %13 : vector<1x32xf32> to vector<8x32xf32>
    %275 = arith.addf %273, %274 : vector<8x32xf32>
    %cst_54 = arith.constant dense<0.000000e+00> : vector<8xf32>
    %276 = vector.multi_reduction <add>, %275, %cst_54 [1] : vector<8x32xf32> to vector<8xf32>
    %277 = vector.shape_cast %276 : vector<8xf32> to vector<8x1xf32>
    %cst_55 = arith.constant 3.200000e+01 : f32
    %278 = vector.broadcast %cst_55 : f32 to vector<8x1xf32>
    %279 = arith.divf %277, %278 : vector<8x1xf32>
    %280 = vector.broadcast %279 : vector<8x1xf32> to vector<8x32xf32>
    %281 = arith.subf %275, %280 : vector<8x32xf32>
    %282 = arith.mulf %281, %281 : vector<8x32xf32>
    %cst_56 = arith.constant dense<0.000000e+00> : vector<8xf32>
    %283 = vector.multi_reduction <add>, %282, %cst_56 [1] : vector<8x32xf32> to vector<8xf32>
    %284 = vector.shape_cast %283 : vector<8xf32> to vector<8x1xf32>
    %cst_57 = arith.constant 3.200000e+01 : f32
    %285 = vector.broadcast %cst_57 : f32 to vector<8x1xf32>
    %286 = arith.divf %284, %285 : vector<8x1xf32>
    %287 = vector.broadcast %279 : vector<8x1xf32> to vector<8x32xf32>
    %288 = arith.subf %275, %287 : vector<8x32xf32>
    %cst_58 = arith.constant 9.99999974E-6 : f32
    %289 = vector.broadcast %cst_58 : f32 to vector<8x1xf32>
    %290 = arith.addf %286, %289 : vector<8x1xf32>
    %291 = math.rsqrt %290 : vector<8x1xf32>
    %292 = vector.broadcast %291 : vector<8x1xf32> to vector<8x32xf32>
    %293 = arith.mulf %288, %292 : vector<8x32xf32>
    %294 = vector.broadcast %18 : vector<1x32xf32> to vector<8x32xf32>
    %295 = arith.mulf %293, %294 : vector<8x32xf32>
    %296 = vector.broadcast %19 : vector<1x32xf32> to vector<8x32xf32>
    %297 = arith.addf %295, %296 : vector<8x32xf32>
    %cst_59 = arith.constant dense<0.000000e+00> : vector<8x32xf32>
    %298 = tpu.matmul %271, %6, %cst_59 {dimension_numbers = #tpu.dot_dimension_numbers<[1], [0], [0], [1], [0, 0, 1, 1], [], []>} : vector<8x32xf32>, vector<32x32xf32>, vector<8x32xf32> -> vector<8x32xf32>
    %299 = arith.addf %172, %298 : vector<8x32xf32>
    %300 = vector.broadcast %13 : vector<1x32xf32> to vector<8x32xf32>
    %301 = arith.addf %299, %300 : vector<8x32xf32>
    %cst_60 = arith.constant dense<0.000000e+00> : vector<8xf32>
    %302 = vector.multi_reduction <add>, %301, %cst_60 [1] : vector<8x32xf32> to vector<8xf32>
    %303 = vector.shape_cast %302 : vector<8xf32> to vector<8x1xf32>
    %cst_61 = arith.constant 3.200000e+01 : f32
    %304 = vector.broadcast %cst_61 : f32 to vector<8x1xf32>
    %305 = arith.divf %303, %304 : vector<8x1xf32>
    %306 = vector.broadcast %305 : vector<8x1xf32> to vector<8x32xf32>
    %307 = arith.subf %301, %306 : vector<8x32xf32>
    %308 = arith.mulf %307, %307 : vector<8x32xf32>
    %cst_62 = arith.constant dense<0.000000e+00> : vector<8xf32>
    %309 = vector.multi_reduction <add>, %308, %cst_62 [1] : vector<8x32xf32> to vector<8xf32>
    %310 = vector.shape_cast %309 : vector<8xf32> to vector<8x1xf32>
    %cst_63 = arith.constant 3.200000e+01 : f32
    %311 = vector.broadcast %cst_63 : f32 to vector<8x1xf32>
    %312 = arith.divf %310, %311 : vector<8x1xf32>
    %313 = vector.broadcast %305 : vector<8x1xf32> to vector<8x32xf32>
    %314 = arith.subf %301, %313 : vector<8x32xf32>
    %cst_64 = arith.constant 9.99999974E-6 : f32
    %315 = vector.broadcast %cst_64 : f32 to vector<8x1xf32>
    %316 = arith.addf %312, %315 : vector<8x1xf32>
    %317 = math.rsqrt %316 : vector<8x1xf32>
    %318 = vector.broadcast %317 : vector<8x1xf32> to vector<8x32xf32>
    %319 = arith.mulf %314, %318 : vector<8x32xf32>
    %320 = vector.broadcast %18 : vector<1x32xf32> to vector<8x32xf32>
    %321 = arith.mulf %319, %320 : vector<8x32xf32>
    %322 = vector.broadcast %19 : vector<1x32xf32> to vector<8x32xf32>
    %323 = arith.addf %321, %322 : vector<8x32xf32>
    %cst_65 = arith.constant dense<0.000000e+00> : vector<8x64xf32>
    %324 = tpu.matmul %297, %7, %cst_65 {dimension_numbers = #tpu.dot_dimension_numbers<[1], [0], [0], [1], [0, 0, 1, 1], [], []>} : vector<8x32xf32>, vector<32x64xf32>, vector<8x64xf32> -> vector<8x64xf32>
    %325 = vector.broadcast %14 : vector<1x64xf32> to vector<8x64xf32>
    %326 = arith.addf %324, %325 : vector<8x64xf32>
    %cst_66 = arith.constant 0.000000e+00 : f32
    %327 = vector.broadcast %cst_66 : f32 to vector<8x64xf32>
    %328 = arith.maximumf %326, %327 : vector<8x64xf32>
    %cst_67 = arith.constant dense<0.000000e+00> : vector<8x32xf32>
    %329 = tpu.matmul %328, %8, %cst_67 {dimension_numbers = #tpu.dot_dimension_numbers<[1], [0], [0], [1], [0, 0, 1, 1], [], []>} : vector<8x64xf32>, vector<64x32xf32>, vector<8x32xf32> -> vector<8x32xf32>
    %330 = vector.broadcast %15 : vector<1x32xf32> to vector<8x32xf32>
    %331 = arith.addf %329, %330 : vector<8x32xf32>
    %332 = arith.addf %297, %331 : vector<8x32xf32>
    %cst_68 = arith.constant dense<0.000000e+00> : vector<8xf32>
    %333 = vector.multi_reduction <add>, %332, %cst_68 [1] : vector<8x32xf32> to vector<8xf32>
    %334 = vector.shape_cast %333 : vector<8xf32> to vector<8x1xf32>
    %cst_69 = arith.constant 3.200000e+01 : f32
    %335 = vector.broadcast %cst_69 : f32 to vector<8x1xf32>
    %336 = arith.divf %334, %335 : vector<8x1xf32>
    %337 = vector.broadcast %336 : vector<8x1xf32> to vector<8x32xf32>
    %338 = arith.subf %332, %337 : vector<8x32xf32>
    %339 = arith.mulf %338, %338 : vector<8x32xf32>
    %cst_70 = arith.constant dense<0.000000e+00> : vector<8xf32>
    %340 = vector.multi_reduction <add>, %339, %cst_70 [1] : vector<8x32xf32> to vector<8xf32>
    %341 = vector.shape_cast %340 : vector<8xf32> to vector<8x1xf32>
    %cst_71 = arith.constant 3.200000e+01 : f32
    %342 = vector.broadcast %cst_71 : f32 to vector<8x1xf32>
    %343 = arith.divf %341, %342 : vector<8x1xf32>
    %344 = vector.broadcast %336 : vector<8x1xf32> to vector<8x32xf32>
    %345 = arith.subf %332, %344 : vector<8x32xf32>
    %cst_72 = arith.constant 9.99999974E-6 : f32
    %346 = vector.broadcast %cst_72 : f32 to vector<8x1xf32>
    %347 = arith.addf %343, %346 : vector<8x1xf32>
    %348 = math.rsqrt %347 : vector<8x1xf32>
    %349 = vector.broadcast %348 : vector<8x1xf32> to vector<8x32xf32>
    %350 = arith.mulf %345, %349 : vector<8x32xf32>
    %351 = vector.broadcast %20 : vector<1x32xf32> to vector<8x32xf32>
    %352 = arith.mulf %350, %351 : vector<8x32xf32>
    %353 = vector.broadcast %21 : vector<1x32xf32> to vector<8x32xf32>
    %354 = arith.addf %352, %353 : vector<8x32xf32>
    %cst_73 = arith.constant dense<0.000000e+00> : vector<8x64xf32>
    %355 = tpu.matmul %323, %7, %cst_73 {dimension_numbers = #tpu.dot_dimension_numbers<[1], [0], [0], [1], [0, 0, 1, 1], [], []>} : vector<8x32xf32>, vector<32x64xf32>, vector<8x64xf32> -> vector<8x64xf32>
    %356 = vector.broadcast %14 : vector<1x64xf32> to vector<8x64xf32>
    %357 = arith.addf %355, %356 : vector<8x64xf32>
    %cst_74 = arith.constant 0.000000e+00 : f32
    %358 = vector.broadcast %cst_74 : f32 to vector<8x64xf32>
    %359 = arith.maximumf %357, %358 : vector<8x64xf32>
    %cst_75 = arith.constant dense<0.000000e+00> : vector<8x32xf32>
    %360 = tpu.matmul %359, %8, %cst_75 {dimension_numbers = #tpu.dot_dimension_numbers<[1], [0], [0], [1], [0, 0, 1, 1], [], []>} : vector<8x64xf32>, vector<64x32xf32>, vector<8x32xf32> -> vector<8x32xf32>
    %361 = vector.broadcast %15 : vector<1x32xf32> to vector<8x32xf32>
    %362 = arith.addf %360, %361 : vector<8x32xf32>
    %363 = arith.addf %323, %362 : vector<8x32xf32>
    %cst_76 = arith.constant dense<0.000000e+00> : vector<8xf32>
    %364 = vector.multi_reduction <add>, %363, %cst_76 [1] : vector<8x32xf32> to vector<8xf32>
    %365 = vector.shape_cast %364 : vector<8xf32> to vector<8x1xf32>
    %cst_77 = arith.constant 3.200000e+01 : f32
    %366 = vector.broadcast %cst_77 : f32 to vector<8x1xf32>
    %367 = arith.divf %365, %366 : vector<8x1xf32>
    %368 = vector.broadcast %367 : vector<8x1xf32> to vector<8x32xf32>
    %369 = arith.subf %363, %368 : vector<8x32xf32>
    %370 = arith.mulf %369, %369 : vector<8x32xf32>
    %cst_78 = arith.constant dense<0.000000e+00> : vector<8xf32>
    %371 = vector.multi_reduction <add>, %370, %cst_78 [1] : vector<8x32xf32> to vector<8xf32>
    %372 = vector.shape_cast %371 : vector<8xf32> to vector<8x1xf32>
    %cst_79 = arith.constant 3.200000e+01 : f32
    %373 = vector.broadcast %cst_79 : f32 to vector<8x1xf32>
    %374 = arith.divf %372, %373 : vector<8x1xf32>
    %375 = vector.broadcast %367 : vector<8x1xf32> to vector<8x32xf32>
    %376 = arith.subf %363, %375 : vector<8x32xf32>
    %cst_80 = arith.constant 9.99999974E-6 : f32
    %377 = vector.broadcast %cst_80 : f32 to vector<8x1xf32>
    %378 = arith.addf %374, %377 : vector<8x1xf32>
    %379 = math.rsqrt %378 : vector<8x1xf32>
    %380 = vector.broadcast %379 : vector<8x1xf32> to vector<8x32xf32>
    %381 = arith.mulf %376, %380 : vector<8x32xf32>
    %382 = vector.broadcast %20 : vector<1x32xf32> to vector<8x32xf32>
    %383 = arith.mulf %381, %382 : vector<8x32xf32>
    %384 = vector.broadcast %21 : vector<1x32xf32> to vector<8x32xf32>
    %385 = arith.addf %383, %384 : vector<8x32xf32>
    %386 = tpu.concatenate %354, %385 in 1 : vector<8x32xf32>, vector<8x32xf32> -> vector<8x64xf32>
    %c0_81 = arith.constant 0 : index
    %c0_82 = arith.constant 0 : index
    %387 = vector.load %arg5[%c0_81, %c0_82] : memref<8x64xf32, #tpu.memory_space<vmem>>, vector<8x64xf32>
    tpu.vector_store %arg5[%c0_81, %c0_82], %386 {strides = array<i32>} : memref<8x64xf32, #tpu.memory_space<vmem>>, vector<8x64xf32>,
    return
  }
}

</mosaic_0001>

<bundles_post_ra>
// kernel: tpu_custom_call.1
= control target key start
LH: loop header
LB: loop body
LE: loop exit
PB: predicated region body
PF: predicated region fallthrough
CT: control target
= control target key end

     0   :  { %10 = vsyncpa [#allocation3], 0  ;;  %s5830_s0 = inlined_call_operand.vmem [shape: f32[8,64], index: 0, kind: input, shape index: {}]   ;;  %s5831_s1 = inlined_call_operand.vmem [shape: f32[12,64], index: 1, kind: input, shape index: {}]   ;;  %s5832_s2 = inlined_call_operand.hbm [shape: f32[32,768], index: 2, kind: input, shape index: {}]   ;;  %s5833_s3 = inlined_call_operand.vmem [shape: f32[64,32], index: 3, kind: input, shape index: {}]   ;;  %s5834_s4 = inlined_call_operand.vmem [shape: f32[16,128], index: 4, kind: input, shape index: {}]   ;;  %s5835_s5 = inlined_call_operand.hbm [shape: f32[8,64], index: 5, kind: output, shape index: {}]  }
   0x1   :  { %11 = vsyncpa [#allocation4], 0  ;;  %s5137_s18 = smov [#allocation2]   ;;  %s5089_s22 = scalar_lea.hbm %s5832_s2, 3072 }
   0x2   :  { %s21_s19 = sshll.u32 %s5137_s18, 4  ;;  %p5090_p0 = scmp.ne.s32.totalorder %s5832_s2, %s5089_s22  ;;  %s22_s19 = int_to_ptr.vmem [resolvable:$true] %s21_s19 }
   0x3   :  { %p5093_p1 = scmp.lt.u32.totalorder %s5089_s22, %s5832_s2 }
   0x5   :  { %p5095_p2 = pnand %p5093_p1, %p5090_p0 }
   0x7   :  { %5098 = shalt.err (!%p5095_p2)
}
   0x8   :  { %s5099_s27 = scalar_lea.vmem %s22_s19, 3072  ;;  %p5104_p4 = scmp.lt.s32.totalorder %s22_s19, %s22_s19 }
   0x9   :  { %p5100_p3 = scmp.ne.s32.totalorder %s22_s19, %s5099_s27  ;;  %p5105_p5 = scmp.lt.s32.totalorder %s5099_s27, %s5099_s27 }
   0xb   :  { %p5106_p6 = por %p5105_p5, %p5104_p4 }
   0xd   :  { %p5107_p7 = pnand %p5106_p6, %p5100_p3 }
   0xf   :  { %5110 = shalt.err (!%p5107_p7)
}
  0x10   :  { %s5138_s28 = smov 768   ;;  %s5139_s29 = smov 48  }
  0x11   :  { %27 = dma.hbm_to_vmem [thread:$0]  %s5832_s2, 3072, %s22_s19, [#allocation3], %s5138_s28, %s5138_s28, %s5139_s29  }
  0x12   :  { %5133 = dma.done.wait [#allocation3], 3072  }
  0x13   :  { %5134 = vsyncadd [#allocation3], 4294964224  ;;  %v5140_v0 = vmov 0.0|0.0   ;;  %vm5141_vm0 = vmmov 0   ;;  %v5142_v1 = vmov 0.0   ;;  %v5205_v2 = vld [vmem:[%s5830_s0] sm:$0xff] }
  0x14   :  { %4762 = vmatprep.subr.bf16.mxu1 %v5140_v0  ;;  %4408 = vmatprep.mubr.msk.f32.mxu1 %vm5141_vm0, %v5142_v1  ;;  %v38_v3 = vld [vmem:[#allocation2] sm:$0xff]  ;;  %v39_v4 = vld [vmem:[#allocation2 + $0x30] sm:$0xff]  ;;  %s5143_s2 = smov 96   ;;  %vm87_vm1 = vcmask 261120   ;;  %s5144_s10 = smov 112   ;;  %vm251_vm2 = vcmask 64512  }
  0x15   :  { %4422 = vmatprep.subr.mxu0 %v5142_v1  ;;  %4424 = vmatprep.mubr.msk.f32.mxu0 %vm5141_vm0, %v5142_v1  ;;  %v4763_v5 = vpack.c.bf16 %v39_v4, %v38_v3  ;;  %v40_v6 = vld [vmem:[#allocation2 + $0x60] sm:$0xff]  ;;  %v41_v7 = vld [vmem:[#allocation2 + $0x90] sm:$0xff]  ;;  %s5145_s11 = smov 120   ;;  %s5146_s12 = smov 104   ;;  %vm1575_vm3 = vcmask 130048   ;;  %vm1577_vm4 = vcmask 195584   ;;  %vm5492_vm5 = vmpackc.low %vm251_vm2, %vm251_vm2 }
  0x16   :  { %161 = vrot.lane.b32.xlu0 %v5205_v2, %s5143_s2  ;;  %v4766_v8 = vpack.c.bf16 %v41_v7, %v40_v6  ;;  %v4147_v10 = vld [vmem:[%s5834_s4] ss:$0 sm:$0xff]  ;;  %s5147_s13 = smov 64   ;;  %s5148_s14 = smov 16   ;;  %vm2789_vm6 = vcmask 97280   ;;  %vm2886_vm7 = vcmask 1043456  }
  0x17   :  { %4764 = vmatpush3.bf16.msra.mxu1 %v4763_v5  ;;  %s5149_s15 = smov 8   ;;  %s5150_s16 = smov 24   ;;  %vm5152_vm8 = vmmov 1   ;;  %vm3847_vm10 = vcmask 523264  }
  0x18   :  { %4765 = vmatprep.subr.bf16.mxu1 %v5140_v0  ;;  %s5151_s19 = smov 32   ;;  %vm5645_vm9 = vmpackc.low %vm2886_vm7, %vm5152_vm8 }
  0x1b   :  { %4767 = vmatpush3.bf16.msra.mxu1 %v4766_v8 }
  0x1c   :  { %4768 = vmatprep.subr.bf16.mxu1 %v5140_v0 }
  0x1e   :  { %4409 = vmatmul.mubr.msk.f32.vlgmr.msra.gmra.mrb[0].mxu1 %vm87_vm1, %v5205_v2 }
  0x1f   :  { %4770 = vmatpush3.bf16.msra.mxu1 %v4763_v5  ;;  %4419 = vmatprep.mubr.msk.f32.mxu1 %vm5141_vm0, %v5142_v1 }
  0x20   :  { %4771 = vmatprep.subr.bf16.mxu1 %v5140_v0 }
  0x23   :  { %4773 = vmatpush3.bf16.msra.mxu1 %v4766_v8 }
  0x24   :  { %4427 = vmatprep.subr.mxu1 %v5142_v1 }
  0x88   :  { %v162_v9 = vpop.permute.xlu0 %161 }
  0x89   :  { %4420 = vmatmul.mubr.msk.f32.vlgmr.msra.gmra.mrb[2].mxu1 %vm87_vm1, %v162_v9 }
  0x8a   :  { %4429 = vmatprep.mubr.msk.f32.mxu1 %vm5141_vm0, %v5142_v1 }
  0xf1   :  { %v157_v11 = vpop.f32.mrb[0].mxu1 }
  0xf2   :  { %v5223_v12 = vadd.f32 %v4147_v10, %v157_v11  ;;  %v4410_v13 = vpop.f32.mrb[1].mxu1 }
  0xf4   :  { %238 = vrot.lane.b32.xlu1 %v5223_v12, %s5144_s10  ;;  %236 = vrot.lane.b32.xlu0 %v5223_v12, %s5145_s11 }
  0xf8   :  { %240 = vrot.lane.b32.xlu1 %v5223_v12, %s5146_s12 }
 0x15c   :  { %v231_v14 = vpop.f32.mrb[2].mxu1 }
 0x15d   :  { %v5231_v15 = vadd.f32 %v4147_v10, %v231_v14  ;;  %v4421_v16 = vpop.f32.mrb[3].mxu1 }
 0x15f   :  { %245 = vrot.lane.b32.xlu1 %v5231_v15, %s5144_s10  ;;  %243 = vrot.lane.b32.xlu0 %v5231_v15, %s5145_s11 }
 0x163   :  { %249 = vrot.lane.b32.xlu1 %v5223_v12, %s5143_s2  ;;  %247 = vrot.lane.b32.xlu0 %v5231_v15, %s5146_s12 }
 0x166   :  { %v5241_v17 = vpop.permute.xlu1 %238  ;;  %v5243_v18 = vpop.permute.xlu0 %236 }
 0x167   :  { %402 = vrot.lane.b32.xlu1 %v5241_v17, %s5143_s2  ;;  %326 = vrot.lane.b32.xlu0 %v5243_v18, %s5143_s2 }
 0x16a   :  { %v5249_v19 = vpop.permute.xlu1 %240 }
 0x16b   :  { %554 = vrot.lane.b32.xlu1 %v5231_v15, %s5143_s2  ;;  %478 = vrot.lane.b32.xlu0 %v5249_v19, %s5143_s2 }
 0x1d1   :  { %v5255_v20 = vpop.permute.xlu1 %245  ;;  %v5257_v21 = vpop.permute.xlu0 %243 }
 0x1d2   :  { %706 = vrot.lane.b32.xlu1 %v5255_v20, %s5143_s2  ;;  %630 = vrot.lane.b32.xlu0 %v5257_v21, %s5143_s2 }
 0x1d5   :  { %v250_v22 = vpop.permute.xlu1 %249  ;;  %v5263_v23 = vpop.permute.xlu0 %247 }
 0x1d6   :  { %4423 = vmatpush3.xpose.msk.msra.mxu0 %vm251_vm2, %v250_v22  ;;  %782 = vrot.lane.b32.xlu0 %v5263_v23, %s5143_s2 }
 0x1d7   :  { %4432 = vmatprep.subr.mxu0 %v5142_v1 }
 0x1d9   :  { %4425 = vmatmul.mubr.msk.f32.vlgmr.msra.gmra.mrb[0].mxu0 %vm251_vm2, %v5223_v12  ;;  %v403_v24 = vpop.permute.xlu1 %402  ;;  %v327_v25 = vpop.permute.xlu0 %326 }
 0x1da   :  { %4434 = vmatprep.mubr.msk.f32.mxu0 %vm5141_vm0, %v5142_v1  ;;  %4428 = vmatpush3.xpose.msk.msra.mxu1 %vm251_vm2, %v327_v25 }
 0x1db   :  { %4433 = vmatpush3.xpose.msk.msra.mxu0 %vm251_vm2, %v403_v24  ;;  %4437 = vmatprep.subr.mxu1 %v5142_v1 }
 0x1dc   :  { %4442 = vmatprep.subr.mxu0 %v5142_v1 }
 0x1dd   :  { %v555_v26 = vpop.permute.xlu1 %554  ;;  %4430 = vmatmul.mubr.msk.f32.vlgmr.msra.gmra.mrb[4].mxu1 %vm251_vm2, %v5243_v18  ;;  %v479_v27 = vpop.permute.xlu0 %478 }
 0x1de   :  { %4435 = vmatmul.mubr.msk.f32.vlgmr.msra.gmra.mrb[2].mxu0 %vm251_vm2, %v5241_v17  ;;  %4438 = vmatpush3.xpose.msk.msra.mxu1 %vm251_vm2, %v479_v27 }
 0x1df   :  { %4443 = vmatpush3.xpose.msk.msra.mxu0 %vm251_vm2, %v555_v26  ;;  %4439 = vmatprep.mubr.msk.f32.mxu1 %vm5141_vm0, %v5142_v1 }
 0x1e0   :  { %4444 = vmatprep.mubr.msk.f32.mxu0 %vm5141_vm0, %v5142_v1  ;;  %4452 = vmatprep.subr.mxu0 %v5142_v1 }
 0x1e1   :  { %4447 = vmatprep.subr.mxu1 %v5142_v1  ;;  %4440 = vmatmul.mubr.msk.f32.vlgmr.msra.gmra.mrb[6].mxu1 %vm251_vm2, %v5249_v19 }
 0x1e2   :  { %4445 = vmatmul.mubr.msk.f32.vlgmr.msra.gmra.mrb[4].mxu0 %vm251_vm2, %v5231_v15  ;;  %4449 = vmatprep.mubr.msk.f32.mxu1 %vm5141_vm0, %v5142_v1 }
 0x1e3   :  { %4454 = vmatprep.mubr.msk.f32.mxu0 %vm5141_vm0, %v5142_v1 }
 0x244   :  { %v707_v28 = vpop.permute.xlu1 %706  ;;  %v631_v29 = vpop.permute.xlu0 %630 }
 0x245   :  { %4448 = vmatpush3.xpose.msk.msra.mxu1 %vm251_vm2, %v631_v29  ;;  %4453 = vmatpush3.xpose.msk.msra.mxu0 %vm251_vm2, %v707_v28 }
 0x246   :  { %4457 = vmatprep.subr.mxu1 %v5142_v1  ;;  %4462 = vmatprep.subr.mxu0 %v5142_v1 }
 0x248   :  { %4450 = vmatmul.mubr.msk.f32.vlgmr.msra.gmra.mrb[8].mxu1 %vm251_vm2, %v5257_v21  ;;  %4455 = vmatmul.mubr.msk.f32.vlgmr.msra.gmra.mrb[6].mxu0 %vm251_vm2, %v5255_v20  ;;  %v783_v30 = vpop.permute.xlu0 %782 }
 0x249   :  { %4458 = vmatpush3.xpose.msk.msra.mxu1 %vm251_vm2, %v783_v30  ;;  %4459 = vmatprep.mubr.msk.f32.mxu1 %vm5141_vm0, %v5142_v1 }
 0x24a   :  { %4467 = vmatprep.subr.mxu1 %v5142_v1  ;;  %4464 = vmatprep.mubr.msk.f32.mxu0 %vm5141_vm0, %v5142_v1 }
 0x24c   :  { %4460 = vmatmul.mubr.msk.f32.vlgmr.msra.gmra.mrb[10].mxu1 %vm251_vm2, %v5263_v23 }
 0x24d   :  { %4469 = vmatprep.mubr.msk.f32.mxu1 %vm5141_vm0, %v5142_v1 }
 0x2ac   :  { %v322_v31 = vpop.f32.mrb[0].mxu0 }
 0x2ad   :  { %v858_v32 = vmul.f32 0.35355338, %v322_v31  ;;  %v4426_v33 = vpop.f32.mrb[1].mxu0 }
 0x2af   :  { %v866_v34 = vsel %vm251_vm2, %v858_v32, -inf }
 0x2b0   :  { %867 = vmax.xlane.f32.xlu1 %v866_v34  ;;  %v398_v35 = vpop.f32.mrb[4].mxu1 }
 0x2b1   :  { %v474_v36 = vpop.f32.mrb[2].mxu0  ;;  %v859_v37 = vmul.f32 0.35355338, %v398_v35  ;;  %v4431_v38 = vpop.f32.mrb[5].mxu1 }
 0x2b2   :  { %v4436_v39 = vpop.f32.mrb[3].mxu0  ;;  %v860_v40 = vmul.f32 0.35355338, %v474_v36 }
 0x2b3   :  { %v869_v41 = vsel %vm251_vm2, %v859_v37, -inf }
 0x2b4   :  { %870 = vmax.xlane.f32.xlu0 %v869_v41  ;;  %v550_v43 = vpop.f32.mrb[6].mxu1  ;;  %v872_v48 = vsel %vm251_vm2, %v860_v40, -inf }
 0x2b5   :  { %v626_v42 = vpop.f32.mrb[4].mxu0  ;;  %v861_v44 = vmul.f32 0.35355338, %v550_v43  ;;  %v4441_v45 = vpop.f32.mrb[7].mxu1 }
 0x2b6   :  { %v4446_v46 = vpop.f32.mrb[5].mxu0  ;;  %v862_v47 = vmul.f32 0.35355338, %v626_v42 }
 0x2b7   :  { %v875_v49 = vsel %vm251_vm2, %v861_v44, -inf }
 0x2b8   :  { %873 = vmax.xlane.f32.xlu0 %v872_v48  ;;  %876 = vmax.xlane.f32.xlu1 %v875_v49  ;;  %v878_v50 = vsel %vm251_vm2, %v862_v47, -inf }
 0x2bc   :  { %879 = vmax.xlane.f32.xlu0 %v878_v50 }
 0x31b   :  { %v702_v51 = vpop.f32.mrb[8].mxu1  ;;  %v778_v52 = vpop.f32.mrb[6].mxu0 }
 0x31c   :  { %v863_v53 = vmul.f32 0.35355338, %v702_v51  ;;  %v864_v54 = vmul.f32 0.35355338, %v778_v52  ;;  %v4451_v55 = vpop.f32.mrb[9].mxu1  ;;  %v4456_v56 = vpop.f32.mrb[7].mxu0 }
 0x31e   :  { %v884_v57 = vsel %vm251_vm2, %v864_v54, -inf  ;;  %v881_v58 = vsel %vm251_vm2, %v863_v53, -inf }
 0x31f   :  { %885 = vmax.xlane.f32.xlu0 %v884_v57  ;;  %882 = vmax.xlane.f32.xlu1 %v881_v58  ;;  %v854_v59 = vpop.f32.mrb[10].mxu1 }
 0x320   :  { %v865_v60 = vmul.f32 0.35355338, %v854_v59  ;;  %v4461_v61 = vpop.f32.mrb[11].mxu1 }
 0x322   :  { %v887_v62 = vsel %vm251_vm2, %v865_v60, -inf }
 0x323   :  { %888 = vmax.xlane.f32.xlu1 %v887_v62 }
 0x334   :  { %1030 = vrot.lane.b32.xlu1 %v5243_v18, %s5147_s13 }
 0x338   :  { %1106 = vrot.lane.b32.xlu1 %v5241_v17, %s5147_s13 }
 0x33c   :  { %1258 = vrot.lane.b32.xlu1 %v5231_v15, %s5147_s13 }
 0x33d   :  { %v868_v63 = vpop.xlane.xlu1 %867 }
 0x33e   :  { %v890_v3 = vsub.f32 %v858_v32, %v868_v63 }
 0x340   :  { %v898_v4 = vmul.f32 1.442695, %v890_v3 }
 0x341   :  { %v871_v5 = vpop.xlane.xlu0 %870 }
 0x342   :  { %5013 = vpow2.f32 %v898_v4  ;;  %v891_v6 = vsub.f32 %v859_v37, %v871_v5 }
 0x344   :  { %v900_v10 = vmul.f32 1.442695, %v891_v6 }
 0x345   :  { %v877_v7 = vpop.xlane.xlu1 %876  ;;  %v874_v18 = vpop.xlane.xlu0 %873 }
 0x346   :  { %v893_v11 = vsub.f32 %v861_v44, %v877_v7  ;;  %5015 = vpow2.f32 %v900_v10  ;;  %v892_v22 = vsub.f32 %v860_v40, %v874_v18 }
 0x348   :  { %v904_v13 = vmul.f32 1.442695, %v893_v11  ;;  %v902_v25 = vmul.f32 1.442695, %v892_v22 }
 0x349   :  { %v880_v24 = vpop.xlane.xlu0 %879 }
 0x34a   :  { %5017 = vpow2.f32 %v904_v13  ;;  %v894_v26 = vsub.f32 %v862_v47, %v880_v24 }
 0x34b   :  { %5019 = vpow2.f32 %v902_v25 }
 0x34c   :  { %v5329_v8 = vpop.eup %5013  ;;  %v906_v27 = vmul.f32 1.442695, %v894_v26 }
 0x34d   :  { %v914_v9 = vsel %vm251_vm2, %v5329_v8, 0.0 }
 0x34e   :  { %915 = vadd.xlane.f32.xlu0 %v914_v9  ;;  %5021 = vpow2.f32 %v906_v27 }
 0x350   :  { %v5333_v14 = vpop.eup %5015 }
 0x351   :  { %v917_v15 = vsel %vm251_vm2, %v5333_v14, 0.0 }
 0x354   :  { %v5337_v16 = vpop.eup %5017 }
 0x355   :  { %v923_v17 = vsel %vm251_vm2, %v5337_v16, 0.0  ;;  %v5347_v28 = vpop.eup %5019 }
 0x358   :  { %v5351_v29 = vpop.eup %5021 }
 0x360   :  { %918 = vadd.xlane.f32.xlu1 %v917_v15  ;;  %v43_v15 = vld [vmem:[#allocation2 + $0x38] sm:$0xff] }
 0x364   :  { %954 = vrot.lane.b32.xlu0 %v5223_v12, %s5147_s13  ;;  %924 = vadd.xlane.f32.xlu1 %v923_v17  ;;  %v920_v12 = vsel %vm251_vm2, %v5347_v28, 0.0 }
 0x368   :  { %1182 = vrot.lane.b32.xlu0 %v5249_v19, %s5147_s13  ;;  %v926_v19 = vsel %vm251_vm2, %v5351_v29, 0.0 }
 0x36c   :  { %1334 = vrot.lane.b32.xlu0 %v5257_v21, %s5147_s13 }
 0x38b   :  { %921 = vadd.xlane.f32.xlu0 %v920_v12 }
 0x38f   :  { %927 = vadd.xlane.f32.xlu0 %v926_v19  ;;  %v44_v19 = vld [vmem:[#allocation2 + $0x68] sm:$0xff] }
 0x3ac   :  { %v886_v21 = vpop.xlane.xlu0 %885  ;;  %v883_v30 = vpop.xlane.xlu1 %882 }
 0x3ad   :  { %v896_v31 = vsub.f32 %v864_v54, %v886_v21  ;;  %v895_v32 = vsub.f32 %v863_v53, %v883_v30  ;;  %v45_v21 = vld [vmem:[#allocation2 + $0x98] sm:$0xff] }
 0x3ae   :  { %v4778_v30 = vpack.c.bf16 %v45_v21, %v44_v19 }
 0x3af   :  { %v910_v33 = vmul.f32 1.442695, %v896_v31  ;;  %v908_v34 = vmul.f32 1.442695, %v895_v32 }
 0x3b0   :  { %v889_v35 = vpop.xlane.xlu1 %888 }
 0x3b1   :  { %5023 = vpow2.f32 %v910_v33  ;;  %v897_v36 = vsub.f32 %v865_v60, %v889_v35 }
 0x3b2   :  { %5025 = vpow2.f32 %v908_v34 }
 0x3b3   :  { %v912_v37 = vmul.f32 1.442695, %v897_v36 }
 0x3b4   :  { %v1031_v38 = vpop.permute.xlu1 %1030 }
 0x3b5   :  { %5027 = vpow2.f32 %v912_v37  ;;  %4468 = vmatpush3.msra.mxu1 %v1031_v38 }
 0x3b6   :  { %4477 = vmatprep.subr.mxu1 %v5142_v1 }
 0x3b8   :  { %v1107_v47 = vpop.permute.xlu1 %1106 }
 0x3bb   :  { %v5356_v39 = vpop.eup %5023 }
 0x3bc   :  { %v5358_v40 = vpop.eup %5025  ;;  %v932_v41 = vsel %vm251_vm2, %v5356_v39, 0.0  ;;  %v1259_v50 = vpop.permute.xlu1 %1258 }
 0x3bd   :  { %933 = vadd.xlane.f32.xlu0 %v932_v41  ;;  %v929_v42 = vsel %vm251_vm2, %v5358_v40, 0.0 }
 0x3be   :  { %930 = vadd.xlane.f32.xlu1 %v929_v42 }
 0x3bf   :  { %v5364_v43 = vpop.eup %5027 }
 0x3c0   :  { %v935_v44 = vsel %vm251_vm2, %v5364_v43, 0.0 }
 0x3c2   :  { %936 = vadd.xlane.f32.xlu1 %v935_v44 }
 0x3d3   :  { %1410 = vrot.lane.b32.xlu1 %v5255_v20, %s5147_s13  ;;  %1486 = vrot.lane.b32.xlu0 %v5263_v23, %s5147_s13 }
 0x3db   :  { %v916_v45 = vpop.xlane.xlu0 %915 }
 0x3dc   :  { %5029 = vrcp.f32 %v916_v45 }
 0x3df   :  { %v955_v46 = vpop.permute.xlu0 %954 }
 0x3e0   :  { %4463 = vmatpush3.msra.mxu0 %v955_v46 }
 0x3e1   :  { %4472 = vmatprep.subr.mxu0 %v5142_v1 }
 0x3e3   :  { %v1183_v52 = vpop.permute.xlu0 %1182 }
 0x3e6   :  { %v5030_v48 = vpop.eup %5029 }
 0x3e7   :  { %v946_v49 = vmul.f32 %v5030_v48, %v5329_v8  ;;  %v1335_v56 = vpop.permute.xlu0 %1334 }
 0x3e9   :  { %4465 = vmatmul.mubr.msk.f32.vlgmr.msra.gmra.mrb[8].mxu0 %vm251_vm2, %v946_v49  ;;  %v4175_v49 = vld [vmem:[%s5834_s4 + $0x1] ss:$0 sm:$0xff] }
 0x3ea   :  { %4473 = vmatpush3.msra.mxu0 %v1107_v47  ;;  %4474 = vmatprep.mubr.msk.f32.mxu0 %vm5141_vm0, %v5142_v1 }
 0x3eb   :  { %4482 = vmatprep.subr.mxu0 %v5142_v1 }
 0x3ed   :  { %v919_v20 = vpop.xlane.xlu1 %918 }
 0x3ee   :  { %5031 = vrcp.f32 %v919_v20 }
 0x3f1   :  { %v925_v23 = vpop.xlane.xlu1 %924 }
 0x3f2   :  { %5033 = vrcp.f32 %v925_v23 }
 0x3f8   :  { %v5032_v51 = vpop.eup %5031 }
 0x3f9   :  { %v947_v53 = vmul.f32 %v5032_v51, %v5333_v14  ;;  %v42_v14 = vld [vmem:[#allocation2 + $0x8] sm:$0xff] }
 0x3fb   :  { %4470 = vmatmul.mubr.msk.f32.vlgmr.msra.gmra.mrb[12].mxu1 %vm251_vm2, %v947_v53 }
 0x3fc   :  { %v5034_v54 = vpop.eup %5033  ;;  %4478 = vmatpush3.msra.mxu1 %v1183_v52  ;;  %4479 = vmatprep.mubr.msk.f32.mxu1 %vm5141_vm0, %v5142_v1 }
 0x3fd   :  { %v949_v55 = vmul.f32 %v5034_v54, %v5337_v16  ;;  %4487 = vmatprep.subr.mxu1 %v5142_v1  ;;  %v4775_v16 = vpack.c.bf16 %v43_v15, %v42_v14  ;;  %v47_v14 = vld [vmem:[#allocation2 + $0x40] sm:$0xff] }
 0x3ff   :  { %4480 = vmatmul.mubr.msk.f32.vlgmr.msra.gmra.mrb[14].mxu1 %vm251_vm2, %v949_v55 }
 0x400   :  { %4488 = vmatpush3.msra.mxu1 %v1335_v56  ;;  %4489 = vmatprep.mubr.msk.f32.mxu1 %vm5141_vm0, %v5142_v1 }
 0x401   :  { %4497 = vmatprep.subr.mxu1 %v5142_v1 }
 0x418   :  { %v922_v57 = vpop.xlane.xlu0 %921 }
 0x419   :  { %5035 = vrcp.f32 %v922_v57 }
 0x41c   :  { %v928_v58 = vpop.xlane.xlu0 %927 }
 0x41d   :  { %5037 = vrcp.f32 %v928_v58 }
 0x423   :  { %v5036_v59 = vpop.eup %5035 }
 0x424   :  { %v948_v60 = vmul.f32 %v5036_v59, %v5347_v28 }
 0x426   :  { %4475 = vmatmul.mubr.msk.f32.vlgmr.msra.gmra.mrb[10].mxu0 %vm251_vm2, %v948_v60 }
 0x427   :  { %v5038_v61 = vpop.eup %5037  ;;  %4483 = vmatpush3.msra.mxu0 %v1259_v50  ;;  %4484 = vmatprep.mubr.msk.f32.mxu0 %vm5141_vm0, %v5142_v1 }
 0x428   :  { %v950_v62 = vmul.f32 %v5038_v61, %v5351_v29  ;;  %4492 = vmatprep.subr.mxu0 %v5142_v1 }
 0x42a   :  { %4485 = vmatmul.mubr.msk.f32.vlgmr.msra.gmra.mrb[12].mxu0 %vm251_vm2, %v950_v62 }
 0x42b   :  { %4494 = vmatprep.mubr.msk.f32.mxu0 %vm5141_vm0, %v5142_v1 }
 0x44a   :  { %v934_v63 = vpop.xlane.xlu0 %933 }
 0x44b   :  { %5039 = vrcp.f32 %v934_v63  ;;  %v931_v3 = vpop.xlane.xlu1 %930 }
 0x44c   :  { %5041 = vrcp.f32 %v931_v3 }
 0x44e   :  { %v1487_v10 = vpop.permute.xlu0 %1486 }
 0x44f   :  { %v937_v4 = vpop.xlane.xlu1 %936 }
 0x450   :  { %5043 = vrcp.f32 %v937_v4  ;;  %v4177_v4 = vld [vmem:[%s5834_s4 + $0x8] ss:$0 sm:$0xff] }
 0x453   :  { %v1411_v5 = vpop.permute.xlu1 %1410 }
 0x454   :  { %4493 = vmatpush3.msra.mxu0 %v1411_v5 }
 0x455   :  { %v5040_v6 = vpop.eup %5039  ;;  %4774 = vmatprep.subr.bf16.mxu0 %v5140_v0 }
 0x456   :  { %v5042_v7 = vpop.eup %5041  ;;  %v952_v8 = vmul.f32 %v5040_v6, %v5356_v39 }
 0x457   :  { %v951_v9 = vmul.f32 %v5042_v7, %v5358_v40  ;;  %v4176_v7 = vld [vmem:[%s5834_s4 + $0x7] ss:$0 sm:$0xff] }
 0x458   :  { %4495 = vmatmul.mubr.msk.f32.vlgmr.msra.gmra.mrb[14].mxu0 %vm251_vm2, %v952_v8 }
 0x459   :  { %4490 = vmatmul.mubr.msk.f32.vlgmr.msra.gmra.mrb[16].mxu1 %vm251_vm2, %v951_v9  ;;  %4510 = vmatprep.mubr.msk.f32.mxu0 %vm5141_vm0, %v5142_v1 }
 0x45a   :  { %v5044_v11 = vpop.eup %5043  ;;  %4498 = vmatpush3.msra.mxu1 %v1487_v10  ;;  %4499 = vmatprep.mubr.msk.f32.mxu1 %vm5141_vm0, %v5142_v1 }
 0x45b   :  { %v953_v13 = vmul.f32 %v5044_v11, %v5364_v43  ;;  %4780 = vmatprep.subr.bf16.mxu1 %v5140_v0  ;;  %4776 = vmatpush3.bf16.msra.mxu0 %v4775_v16 }
 0x45c   :  { %4777 = vmatprep.subr.bf16.mxu0 %v5140_v0 }
 0x45d   :  { %4500 = vmatmul.mubr.msk.f32.vlgmr.msra.gmra.mrb[18].mxu1 %vm251_vm2, %v953_v13  ;;  %v46_v13 = vld [vmem:[#allocation2 + $0x10] sm:$0xff] }
 0x45e   :  { %4521 = vmatprep.mubr.msk.f32.mxu1 %vm5141_vm0, %v5142_v1  ;;  %4782 = vmatpush3.bf16.msra.mxu1 %v4775_v16  ;;  %v4787_v15 = vpack.c.bf16 %v47_v14, %v46_v13  ;;  %v48_v16 = vld [vmem:[#allocation2 + $0x70] sm:$0xff] }
 0x45f   :  { %4783 = vmatprep.subr.bf16.mxu1 %v5140_v0  ;;  %4779 = vmatpush3.bf16.msra.mxu0 %v4778_v30 }
 0x460   :  { %4786 = vmatprep.subr.bf16.mxu0 %v5140_v0 }
 0x462   :  { %4785 = vmatpush3.bf16.msra.mxu1 %v4778_v30 }
 0x463   :  { %4792 = vmatprep.subr.bf16.mxu1 %v5140_v0 }
 0x4bc   :  { %v1026_v17 = vpop.f32.mrb[8].mxu0 }
 0x4bd   :  { %v4466_v18 = vpop.f32.mrb[9].mxu0 }
 0x4be   :  { %v50_v18 = vld [vmem:[#allocation2 + $0x18] sm:$0xff] }
 0x4ce   :  { %v1102_v22 = vpop.f32.mrb[12].mxu1 }
 0x4cf   :  { %v4471_v24 = vpop.f32.mrb[13].mxu1 }
 0x4d0   :  { %v51_v24 = vld [vmem:[#allocation2 + $0x48] sm:$0xff] }
 0x4d2   :  { %v1254_v25 = vpop.f32.mrb[14].mxu1 }
 0x4d3   :  { %v4481_v26 = vpop.f32.mrb[15].mxu1 }
 0x4f9   :  { %v1178_v27 = vpop.f32.mrb[10].mxu0 }
 0x4fa   :  { %v4476_v28 = vpop.f32.mrb[11].mxu0 }
 0x4fd   :  { %v1330_v12 = vpop.f32.mrb[12].mxu0 }
 0x4fe   :  { %v4486_v29 = vpop.f32.mrb[13].mxu0 }
 0x52b   :  { %v1482_v31 = vpop.f32.mrb[14].mxu0 }
 0x52c   :  { %v1406_v32 = vpop.f32.mrb[16].mxu1  ;;  %1584 = vrot.lane.b32.xlu0 %v1482_v31, %s5148_s14  ;;  %v4496_v33 = vpop.f32.mrb[15].mxu0 }
 0x52d   :  { %1580 = vrot.lane.b32.xlu1 %v1406_v32, %s5149_s15  ;;  %v4491_v34 = vpop.f32.mrb[17].mxu1  ;;  %v36_v32 = vld [vmem:[%s5831_s1] sm:$0xff]  ;;  %v37_v33 = vld [vmem:[%s5831_s1 + $0x8] sm:$0xf] }
 0x530   :  { %v1558_v35 = vpop.f32.mrb[18].mxu1  ;;  %1563 = vrot.lane.b32.xlu0 %v1102_v22, %s5149_s15 }
 0x531   :  { %1588 = vrot.lane.b32.xlu1 %v1558_v35, %s5150_s16  ;;  %v4501_v36 = vpop.f32.mrb[19].mxu1 }
 0x534   :  { %1571 = vrot.lane.b32.xlu0 %v1254_v25, %s5150_s16  ;;  %v4798_v25 = vpack.c.bf16 %v51_v24, %v50_v18 }
 0x535   :  { %1567 = vrot.lane.b32.xlu1 %v1178_v27, %s5148_s14 }
 0x538   :  { %1776 = vrot.lane.b32.xlu0 %v4175_v49, %s5151_s19 }
 0x59e   :  { %v1585_v37 = vpop.permute.xlu0 %1584 }
 0x59f   :  { %v1581_v38 = vpop.permute.xlu1 %1580 }
 0x5a0   :  { %v1591_v39 = vsel %vm251_vm2, %v1330_v12, %v1581_v38 }
 0x5a1   :  { %v1592_v41 = vsel %vm1575_vm3, %v1591_v39, %v1585_v37  ;;  %v52_v39 = vld [vmem:[#allocation2 + $0x78] sm:$0xff] }
 0x5a2   :  { %v1564_v40 = vpop.permute.xlu0 %1563 }
 0x5a3   :  { %v1589_v42 = vpop.permute.xlu1 %1588  ;;  %v1574_v45 = vsel %vm251_vm2, %v1026_v17, %v1564_v40  ;;  %v49_v17 = vld [vmem:[#allocation2 + $0xa0] sm:$0xff]  ;;  %v53_v40 = vld [vmem:[#allocation2 + $0xa8] sm:$0xff] }
 0x5a4   :  { %v1593_v43 = vsel %vm1577_vm4, %v1592_v41, %v1589_v42  ;;  %v4790_v22 = vpack.c.bf16 %v49_v17, %v48_v16 }
 0x5a5   :  { %4522 = vmatmul.mubr.msk.f32.vlgmr.msra.gmra.mrb[20].mxu1 %vm87_vm1, %v1593_v43  ;;  %v4802_v43 = vpack.c.bf16 %v53_v40, %v52_v39 }
 0x5a6   :  { %v1572_v44 = vpop.permute.xlu0 %1571  ;;  %4543 = vmatprep.mubr.msk.f32.mxu1 %vm5141_vm0, %v5142_v1  ;;  %4794 = vmatpush3.bf16.msra.mxu1 %v4787_v15 }
 0x5a7   :  { %v1568_v46 = vpop.permute.xlu1 %1567  ;;  %4795 = vmatprep.subr.bf16.mxu1 %v5140_v0 }
 0x5a8   :  { %v1576_v47 = vsel %vm1575_vm3, %v1574_v45, %v1568_v46 }
 0x5a9   :  { %v1578_v48 = vsel %vm1577_vm4, %v1576_v47, %v1572_v44  ;;  %v4179_v47 = vld [vmem:[%s5834_s4 + $0x2] ss:$0 sm:$0xff] }
 0x5aa   :  { %4511 = vmatmul.mubr.msk.f32.vlgmr.msra.gmra.mrb[16].mxu0 %vm87_vm1, %v1578_v48  ;;  %v1777_v53 = vpop.permute.xlu0 %1776  ;;  %4797 = vmatpush3.bf16.msra.mxu1 %v4790_v22 }
 0x5ab   :  { %4532 = vmatprep.mubr.msk.f32.mxu0 %vm5141_vm0, %v5142_v1  ;;  %4788 = vmatpush3.bf16.msra.mxu0 %v4787_v15 }
 0x5ac   :  { %4789 = vmatprep.subr.bf16.mxu0 %v5140_v0  ;;  %4807 = vmatprep.subr.bf16.mxu1 %v4798_v25 }
 0x5af   :  { %4791 = vmatpush3.bf16.msra.mxu0 %v4790_v22 }
 0x5b0   :  { %4799 = vmatprep.subr.bf16.mxu0 %v4798_v25 }
 0x678   :  { %v1766_v50 = vpop.f32.mrb[20].mxu1 }
 0x679   :  { %1771 = vrot.lane.b32.xlu1 %v1766_v50, %s5151_s19  ;;  %v4523_v20 = vpop.f32.mrb[21].mxu1 }
 0x67a   :  { %v4182_v20 = vld [vmem:[%s5834_s4 + $0x3] ss:$0 sm:$0xff] }
 0x67d   :  { %v1663_v23 = vpop.f32.mrb[16].mxu0 }
 0x67e   :  { %v4512_v51 = vpop.f32.mrb[17].mxu0  ;;  %v1667_v62 = vadd.f32 %v1663_v23, %v5205_v2 }
 0x680   :  { %v1672_v63 = vadd.f32 %v4175_v49, %v1667_v62 }
 0x682   :  { %v1673_v3 = vsel %vm87_vm1, %v1672_v63, 0.0 }
 0x6eb   :  { %v1772_v52 = vpop.permute.xlu1 %1771 }
 0x6ec   :  { %v1774_v54 = vadd.f32 %v1772_v52, %v5205_v2 }
 0x6ee   :  { %v1779_v55 = vadd.f32 %v1777_v53, %v1774_v54 }
 0x6f0   :  { %1781 = vrot.lane.b32.xlu1 %v1779_v55, %s5143_s2 }
 0x762   :  { %v1782_v56 = vpop.permute.xlu1 %1781 }
 0x763   :  { %v1784_v57 = vsel %vm87_vm1, %v1782_v56, 0.0 }
 0x764   :  { %1785 = vadd.xlane.f32.xlu0 %v1784_v57 }
 0x7f1   :  { %v1786_v58 = vpop.xlane.xlu0 %1785 }
 0x7f2   :  { %v1787_v59 = vmul.f32 0.03125, %v1786_v58 }
 0x7f4   :  { %v1788_v60 = vsub.f32 %v1779_v55, %v1787_v59 }
 0x7f6   :  { %v1789_v61 = vmul.f32 %v1788_v60, %v1788_v60 }
 0x7f8   :  { %1791 = vrot.lane.b32.xlu1 %v1789_v61, %s5143_s2 }
 0x81c   :  { %1674 = vadd.xlane.f32.xlu1 %v1673_v3 }
 0x82d   :  { %1807 = vrot.lane.b32.xlu1 %v4177_v4, %s5151_s19 }
 0x86a   :  { %v1792_v5 = vpop.permute.xlu1 %1791 }
 0x86b   :  { %v1794_v6 = vsel %vm87_vm1, %v1792_v5, 0.0 }
 0x86c   :  { %1795 = vadd.xlane.f32.xlu0 %v1794_v6 }
 0x882   :  { %1802 = vrot.lane.b32.xlu0 %v4176_v7, %s5151_s19 }
 0x8a9   :  { %v1675_v2 = vpop.xlane.xlu1 %1674 }
 0x8aa   :  { %v1677_v8 = vmul.f32 0.03125, %v1675_v2 }
 0x8ac   :  { %v1678_v9 = vsub.f32 %v1672_v63, %v1677_v8 }
 0x8ad   :  { %v1808_v21 = vpop.permute.xlu1 %1807 }
 0x8ae   :  { %v1679_v10 = vmul.f32 %v1678_v9, %v1678_v9 }
 0x8b0   :  { %v1680_v11 = vsel %vm87_vm1, %v1679_v10, 0.0 }
 0x8b1   :  { %1681 = vadd.xlane.f32.xlu0 %v1680_v11 }
 0x8f9   :  { %v1796_v26 = vpop.xlane.xlu0 %1795 }
 0x8fa   :  { %v1797_v27 = vmul.f32 0.03125, %v1796_v26 }
 0x8fc   :  { %v1798_v28 = vadd.f32 1e-05, %v1797_v27 }
 0x8fd   :  { %v1803_v19 = vpop.permute.xlu0 %1802 }
 0x8fe   :  { %5045 = vrsqrt.f32 %v1798_v28 }
 0x908   :  { %v5046_v12 = vpop.eup %5045 }
 0x909   :  { %v1800_v29 = vmul.f32 %v5046_v12, %v1788_v60 }
 0x90b   :  { %v1805_v30 = vmul.f32 %v1803_v19, %v1800_v29 }
 0x90d   :  { %v5456_v31 = vadd.f32 %v1808_v21, %v1805_v30 }
 0x90f   :  { %1889 = vrot.lane.b32.xlu1 %v5456_v31, %s5143_s2 }
 0x913   :  { %2048 = vrot.lane.b32.xlu1 %v36_v32, %s5143_s2 }
 0x917   :  { %2050 = vrot.lane.b32.xlu1 %v37_v33, %s5143_s2 }
 0x93e   :  { %v1682_v34 = vpop.xlane.xlu0 %1681 }
 0x93f   :  { %v1683_v35 = vmul.f32 0.03125, %v1682_v34 }
 0x941   :  { %v1684_v36 = vadd.f32 1e-05, %v1683_v35 }
 0x943   :  { %5047 = vrsqrt.f32 %v1684_v36 }
 0x94d   :  { %v5048_v37 = vpop.eup %5047 }
 0x94e   :  { %v1686_v38 = vmul.f32 %v5048_v37, %v1678_v9 }
 0x950   :  { %v1691_v41 = vmul.f32 %v4176_v7, %v1686_v38 }
 0x952   :  { %v5468_v42 = vadd.f32 %v4177_v4, %v1691_v41 }
 0x954   :  { %4533 = vmatmul.mubr.msk.f32.vlgmr.msra.gmra.mrb[18].mxu0 %vm87_vm1, %v5468_v42 }
 0x955   :  { %4801 = vmatpush3.bf16.msra.mxu0 %v4798_v25  ;;  %4554 = vmatprep.mubr.msk.f32.mxu0 %vm87_vm1, %v36_v32 }
 0x956   :  { %4803 = vmatprep.subr.bf16.mxu0 %v4802_v43 }
 0x959   :  { %4805 = vmatpush3.bf16.msra.mxu0 %v4802_v43 }
 0x95a   :  { %4814 = vmatprep.subr.bf16.mxu0 %v5140_v0 }
 0x95c   :  { %4555 = vmatmul.mubr.msk.f32.vlgmr.msra.gmra.mrb[20].mxu0 %vm87_vm1, %v37_v33 }
 0x95d   :  { %4572 = vmatprep.mubr.msk.f32.mxu0 %vm5141_vm0, %v5142_v1 }
 0x981   :  { %v1890_v44 = vpop.permute.xlu1 %1889 }
 0x982   :  { %4544 = vmatmul.mubr.msk.f32.vlgmr.msra.gmra.mrb[22].mxu1 %vm87_vm1, %v1890_v44 }
 0x983   :  { %4809 = vmatpush3.bf16.msra.mxu1 %v4798_v25 }
 0x984   :  { %4811 = vmatprep.subr.bf16.mxu1 %v4802_v43 }
 0x985   :  { %v2049_v45 = vpop.permute.xlu1 %2048 }
 0x986   :  { %4565 = vmatprep.mubr.msk.f32.mxu1 %vm87_vm1, %v2049_v45 }
 0x987   :  { %4813 = vmatpush3.bf16.msra.mxu1 %v4802_v43 }
 0x988   :  { %4818 = vmatprep.subr.bf16.mxu1 %v5140_v0 }
 0x989   :  { %v2051_v46 = vpop.permute.xlu1 %2050 }
 0x98a   :  { %4566 = vmatmul.mubr.msk.f32.vlgmr.msra.gmra.mrb[24].mxu1 %vm87_vm1, %v2051_v46 }
 0x98b   :  { %4579 = vmatprep.mubr.msk.f32.mxu1 %vm5141_vm0, %v5142_v1 }
 0xa27   :  { %v1884_v48 = vpop.f32.mrb[18].mxu0 }
 0xa28   :  { %v1885_v49 = vadd.f32 %v4179_v47, %v1884_v48  ;;  %v4534_v50 = vpop.f32.mrb[19].mxu0 }
 0xa2a   :  { %2134 = vrot.lane.b32.xlu0 %v1885_v49, %s5144_s10 }
 0xa2f   :  { %v4556_v23 = vpop.f32.mrb[20].mxu0 }
 0xa30   :  { %v2045_v51 = vadd.f32 %v4556_v23, %v4182_v20  ;;  %v2039_v52 = vpop.f32.mrb[21].mxu0 }
 0xa31   :  { %v2040_v53 = vadd.f32 %v4182_v20, %v2039_v52 }
 0xa33   :  { %v4815_v55 = vpack.c.bf16 %v2045_v51, %v2040_v53  ;;  %v5496_v56 = vpack.i.bf16 %v2045_v51, %v2040_v53 }
 0xa35   :  { %4817 = vmatpush3.bf16.xpose.msk.msra.mxu0 %vm5492_vm5, %v4815_v55  ;;  %4944 = vrot.lane.b32.xlu1 %v5496_v56, %s5145_s11 }
 0xa36   :  { %4822 = vmatprep.subr.bf16.mxu0 %v5140_v0 }
 0xa39   :  { %4949 = vrot.lane.b32.xlu1 %v5496_v56, %s5144_s10 }
 0xa3c   :  { %4573 = vmatmul.mubr.msk.f32.vlgmr.msra.gmra.mrb[22].mxu0 %vm251_vm2, %v1885_v49 }
 0xa3d   :  { %4954 = vrot.lane.b32.xlu1 %v5496_v56, %s5146_s12  ;;  %4586 = vmatprep.mubr.msk.f32.mxu0 %vm5141_vm0, %v5142_v1 }
 0xa41   :  { %2132 = vrot.lane.b32.xlu1 %v1885_v49, %s5145_s11 }
 0xa45   :  { %2136 = vrot.lane.b32.xlu1 %v1885_v49, %s5146_s12 }
 0xa55   :  { %v1959_v57 = vpop.f32.mrb[22].mxu1 }
 0xa56   :  { %v1960_v58 = vadd.f32 %v4179_v47, %v1959_v57  ;;  %v4545_v59 = vpop.f32.mrb[23].mxu1 }
 0xa5d   :  { %v4567_v60 = vpop.f32.mrb[24].mxu1 }
 0xa5e   :  { %v2128_v61 = vadd.f32 %v4567_v60, %v4182_v20  ;;  %v2122_v62 = vpop.f32.mrb[25].mxu1 }
 0xa5f   :  { %v2123_v63 = vadd.f32 %v4182_v20, %v2122_v62 }
 0xa61   :  { %v5512_v3 = vpack.i.bf16 %v2128_v61, %v2123_v63  ;;  %v4831_v4 = vpack.c.bf16 %v2128_v61, %v2123_v63 }
 0xa63   :  { %4959 = vrot.lane.b32.xlu1 %v5512_v3, %s5145_s11 }
 0xa67   :  { %4964 = vrot.lane.b32.xlu1 %v5512_v3, %s5144_s10 }
 0xa6b   :  { %4969 = vrot.lane.b32.xlu1 %v5512_v3, %s5146_s12 }
 0xa6f   :  { %2139 = vrot.lane.b32.xlu1 %v1960_v58, %s5145_s11 }
 0xa73   :  { %2141 = vrot.lane.b32.xlu1 %v1960_v58, %s5144_s10 }
 0xa77   :  { %2143 = vrot.lane.b32.xlu1 %v1960_v58, %s5146_s12 }
 0xa9c   :  { %v2135_v18 = vpop.permute.xlu0 %2134 }
 0xaa7   :  { %v5523_v5 = vpop.permute.xlu1 %4944 }
 0xaa8   :  { %v4947_v6 = vunpack.i.h.bf16 %v5523_v5  ;;  %v4946_v7 = vunpack.i.l.bf16 %v5523_v5 }
 0xaaa   :  { %v4819_v2 = vpack.c.bf16 %v4947_v6, %v4946_v7 }
 0xaab   :  { %v5527_v8 = vpop.permute.xlu1 %4949 }
 0xaac   :  { %v4952_v9 = vunpack.i.h.bf16 %v5527_v8  ;;  %v4951_v10 = vunpack.i.l.bf16 %v5527_v8  ;;  %4821 = vmatpush3.bf16.xpose.msk.msra.mxu1 %vm5492_vm5, %v4819_v2 }
 0xaad   :  { %4826 = vmatprep.subr.bf16.mxu1 %v5140_v0 }
 0xaae   :  { %v4823_v11 = vpack.c.bf16 %v4952_v9, %v4951_v10 }
 0xaaf   :  { %v5534_v13 = vpop.permute.xlu1 %4954 }
 0xab0   :  { %v4957_v14 = vunpack.i.h.bf16 %v5534_v13  ;;  %v4956_v15 = vunpack.i.l.bf16 %v5534_v13  ;;  %4825 = vmatpush3.bf16.xpose.msk.msra.mxu0 %vm5492_vm5, %v4823_v11 }
 0xab1   :  { %4830 = vmatprep.subr.bf16.mxu0 %v5140_v0 }
 0xab2   :  { %v4827_v16 = vpack.c.bf16 %v4957_v14, %v4956_v15 }
 0xab3   :  { %v2133_v17 = vpop.permute.xlu1 %2132 }
 0xab4   :  { %4580 = vmatmul.mubr.msk.f32.vlgmr.msra.gmra.mrb[26].mxu1 %vm251_vm2, %v2133_v17 }
 0xab5   :  { %4829 = vmatpush3.bf16.xpose.msk.msra.mxu1 %vm5492_vm5, %v4827_v16  ;;  %4593 = vmatprep.mubr.msk.f32.mxu1 %vm5141_vm0, %v5142_v1 }
 0xab6   :  { %4834 = vmatprep.subr.bf16.mxu1 %v5140_v0 }
 0xab7   :  { %4587 = vmatmul.mubr.msk.f32.vlgmr.msra.gmra.mrb[24].mxu0 %vm251_vm2, %v2135_v18  ;;  %v2137_v22 = vpop.permute.xlu1 %2136 }
 0xab8   :  { %4833 = vmatpush3.bf16.xpose.msk.msra.mxu0 %vm5492_vm5, %v4831_v4  ;;  %4600 = vmatprep.mubr.msk.f32.mxu0 %vm5141_vm0, %v5142_v1 }
 0xab9   :  { %4838 = vmatprep.subr.bf16.mxu0 %v5140_v0 }
 0xabc   :  { %4594 = vmatmul.mubr.msk.f32.vlgmr.msra.gmra.mrb[28].mxu1 %vm251_vm2, %v2137_v22 }
 0xabd   :  { %4607 = vmatprep.mubr.msk.f32.mxu1 %vm5141_vm0, %v5142_v1 }
 0xabf   :  { %4601 = vmatmul.mubr.msk.f32.vlgmr.msra.gmra.mrb[26].mxu0 %vm251_vm2, %v1960_v58 }
 0xac0   :  { %4614 = vmatprep.mubr.msk.f32.mxu0 %vm5141_vm0, %v5142_v1 }
 0xad5   :  { %v5559_v24 = vpop.permute.xlu1 %4959 }
 0xad6   :  { %v4962_v25 = vunpack.i.h.bf16 %v5559_v24  ;;  %v4961_v26 = vunpack.i.l.bf16 %v5559_v24 }
 0xad8   :  { %v4835_v27 = vpack.c.bf16 %v4962_v25, %v4961_v26 }
 0xad9   :  { %v5563_v28 = vpop.permute.xlu1 %4964 }
 0xada   :  { %v4967_v12 = vunpack.i.h.bf16 %v5563_v28  ;;  %v4966_v29 = vunpack.i.l.bf16 %v5563_v28  ;;  %4837 = vmatpush3.bf16.xpose.msk.msra.mxu1 %vm5492_vm5, %v4835_v27 }
 0xadb   :  { %4842 = vmatprep.subr.bf16.mxu1 %v5140_v0 }
 0xadc   :  { %v4839_v19 = vpack.c.bf16 %v4967_v12, %v4966_v29 }
 0xadd   :  { %v5570_v21 = vpop.permute.xlu1 %4969 }
 0xade   :  { %v4972_v30 = vunpack.i.h.bf16 %v5570_v21  ;;  %v4971_v32 = vunpack.i.l.bf16 %v5570_v21  ;;  %4841 = vmatpush3.bf16.xpose.msk.msra.mxu0 %vm5492_vm5, %v4839_v19 }
 0xadf   :  { %4846 = vmatprep.subr.bf16.mxu0 %v5140_v0 }
 0xae0   :  { %v4843_v33 = vpack.c.bf16 %v4972_v30, %v4971_v32 }
 0xae1   :  { %v2140_v34 = vpop.permute.xlu1 %2139 }
 0xae2   :  { %4608 = vmatmul.mubr.msk.f32.vlgmr.msra.gmra.mrb[30].mxu1 %vm251_vm2, %v2140_v34 }
 0xae3   :  { %4845 = vmatpush3.bf16.xpose.msk.msra.mxu1 %vm5492_vm5, %v4843_v33  ;;  %4621 = vmatprep.mubr.msk.f32.mxu1 %vm5141_vm0, %v5142_v1 }
 0xae4   :  { %4850 = vmatprep.subr.bf16.mxu1 %v5140_v0 }
 0xae5   :  { %v2142_v35 = vpop.permute.xlu1 %2141 }
 0xae6   :  { %4615 = vmatmul.mubr.msk.f32.vlgmr.msra.gmra.mrb[28].mxu0 %vm251_vm2, %v2142_v35 }
 0xae7   :  { %4628 = vmatprep.mubr.msk.f32.mxu0 %vm5141_vm0, %v5142_v1 }
 0xae9   :  { %v2144_v36 = vpop.permute.xlu1 %2143 }
 0xaea   :  { %4622 = vmatmul.mubr.msk.f32.vlgmr.msra.gmra.mrb[32].mxu1 %vm251_vm2, %v2144_v36 }
 0xaeb   :  { %4635 = vmatprep.mubr.msk.f32.mxu1 %vm5141_vm0, %v5142_v1 }
 0xb0f   :  { %v2245_v37 = vpop.f32.mrb[22].mxu0 }
 0xb10   :  { %v2781_v38 = vmul.f32 0.35355338, %v2245_v37  ;;  %v4574_v39 = vpop.f32.mrb[23].mxu0 }
 0xb12   :  { %v2790_v40 = vsel %vm2789_vm6, %v2781_v38, -inf }
 0xb13   :  { %2791 = vmax.xlane.f32.xlu0 %v2790_v40 }
 0xb87   :  { %v2321_v41 = vpop.f32.mrb[26].mxu1 }
 0xb88   :  { %v2782_v43 = vmul.f32 0.35355338, %v2321_v41  ;;  %v4581_v44 = vpop.f32.mrb[27].mxu1 }
 0xb8a   :  { %v2397_v45 = vpop.f32.mrb[24].mxu0  ;;  %v2793_v46 = vsel %vm2789_vm6, %v2782_v43, -inf }
 0xb8b   :  { %v2783_v47 = vmul.f32 0.35355338, %v2397_v45  ;;  %v4588_v48 = vpop.f32.mrb[25].mxu0  ;;  %2794 = vmax.xlane.f32.xlu1 %v2793_v46 }
 0xb8d   :  { %v2796_v49 = vsel %vm2789_vm6, %v2783_v47, -inf }
 0xb8e   :  { %2797 = vmax.xlane.f32.xlu0 %v2796_v49 }
 0xb8f   :  { %v2473_v50 = vpop.f32.mrb[28].mxu1 }
 0xb90   :  { %v2784_v20 = vmul.f32 0.35355338, %v2473_v50  ;;  %v4595_v23 = vpop.f32.mrb[29].mxu1 }
 0xb92   :  { %v2799_v51 = vsel %vm2789_vm6, %v2784_v20, -inf  ;;  %v2549_v52 = vpop.f32.mrb[26].mxu0 }
 0xb93   :  { %2800 = vmax.xlane.f32.xlu0 %v2799_v51  ;;  %v2785_v53 = vmul.f32 0.35355338, %v2549_v52  ;;  %v4602_v54 = vpop.f32.mrb[27].mxu0 }
 0xb95   :  { %v2802_v55 = vsel %vm2789_vm6, %v2785_v53, -inf }
 0xb97   :  { %2803 = vmax.xlane.f32.xlu0 %v2802_v55 }
 0xba0   :  { %v2792_v57 = vpop.xlane.xlu0 %2791 }
 0xba1   :  { %v2814_v58 = vsub.f32 %v2781_v38, %v2792_v57 }
 0xba3   :  { %v2822_v59 = vmul.f32 1.442695, %v2814_v58  ;;  %v55_v58 = vld [vmem:[#allocation2 + $0x50] sm:$0xff] }
 0xba5   :  { %5049 = vpow2.f32 %v2822_v59 }
 0xbaf   :  { %v5596_v9 = vpop.eup %5049 }
 0xbb0   :  { %v2838_v16 = vsel %vm2789_vm6, %v5596_v9, 0.0 }
 0xbb5   :  { %v2625_v60 = vpop.f32.mrb[30].mxu1 }
 0xbb6   :  { %v2786_v61 = vmul.f32 0.35355338, %v2625_v60  ;;  %v4609_v62 = vpop.f32.mrb[31].mxu1 }
 0xbb8   :  { %v2805_v63 = vsel %vm2789_vm6, %v2786_v61, -inf }
 0xbb9   :  { %2806 = vmax.xlane.f32.xlu1 %v2805_v63  ;;  %v2701_v4 = vpop.f32.mrb[28].mxu0 }
 0xbba   :  { %v2787_v6 = vmul.f32 0.35355338, %v2701_v4  ;;  %v4616_v7 = vpop.f32.mrb[29].mxu0 }
 0xbbc   :  { %v2808_v2 = vsel %vm2789_vm6, %v2787_v6, -inf }
 0xbbd   :  { %v2777_v10 = vpop.f32.mrb[32].mxu1  ;;  %2809 = vmax.xlane.f32.xlu0 %v2808_v2 }
 0xbbe   :  { %v2788_v11 = vmul.f32 0.35355338, %v2777_v10  ;;  %v4623_v14 = vpop.f32.mrb[33].mxu1 }
 0xbc0   :  { %v2811_v15 = vsel %vm2789_vm6, %v2788_v11, -inf }
 0xbc1   :  { %2812 = vmax.xlane.f32.xlu1 %v2811_v15  ;;  %2839 = vadd.xlane.f32.xlu0 %v2838_v16 }
 0xc18   :  { %v2795_v17 = vpop.xlane.xlu1 %2794 }
 0xc19   :  { %v2815_v18 = vsub.f32 %v2782_v43, %v2795_v17 }
 0xc1b   :  { %v2824_v22 = vmul.f32 1.442695, %v2815_v18  ;;  %v2798_v25 = vpop.xlane.xlu0 %2797 }
 0xc1c   :  { %v2816_v26 = vsub.f32 %v2783_v47, %v2798_v25 }
 0xc1d   :  { %5051 = vpow2.f32 %v2824_v22 }
 0xc1e   :  { %v2826_v27 = vmul.f32 1.442695, %v2816_v26 }
 0xc20   :  { %5053 = vpow2.f32 %v2826_v27  ;;  %v2801_v12 = vpop.xlane.xlu0 %2800 }
 0xc21   :  { %v2817_v29 = vsub.f32 %v2784_v20, %v2801_v12 }
 0xc23   :  { %v2828_v19 = vmul.f32 1.442695, %v2817_v29 }
 0xc24   :  { %v2804_v37 = vpop.xlane.xlu0 %2803 }
 0xc25   :  { %5055 = vpow2.f32 %v2828_v19  ;;  %v2818_v38 = vsub.f32 %v2785_v53, %v2804_v37 }
 0xc27   :  { %v5601_v30 = vpop.eup %5051  ;;  %v2830_v40 = vmul.f32 1.442695, %v2818_v38 }
 0xc28   :  { %v2841_v32 = vsel %vm2789_vm6, %v5601_v30, 0.0 }
 0xc29   :  { %2842 = vadd.xlane.f32.xlu1 %v2841_v32  ;;  %5057 = vpow2.f32 %v2830_v40 }
 0xc2a   :  { %v5605_v33 = vpop.eup %5053 }
 0xc2b   :  { %v2844_v34 = vsel %vm2789_vm6, %v5605_v33, 0.0 }
 0xc2c   :  { %2845 = vadd.xlane.f32.xlu0 %v2844_v34 }
 0xc2f   :  { %v5609_v35 = vpop.eup %5055 }
 0xc30   :  { %v2847_v36 = vsel %vm2789_vm6, %v5609_v35, 0.0 }
 0xc31   :  { %2848 = vadd.xlane.f32.xlu1 %v2847_v36 }
 0xc42   :  { %4979 = vrot.lane.b32.xlu1 %v5523_v5, %s5143_s2  ;;  %4974 = vrot.lane.b32.xlu0 %v5496_v56, %s5143_s2 }
 0xc46   :  { %4984 = vrot.lane.b32.xlu1 %v5527_v8, %s5143_s2  ;;  %4994 = vrot.lane.b32.xlu0 %v5512_v3, %s5143_s2  ;;  %v2807_v56 = vpop.xlane.xlu1 %2806  ;;  %v5625_v3 = vpop.eup %5057 }
 0xc47   :  { %v2819_v43 = vsub.f32 %v2786_v61, %v2807_v56  ;;  %v2850_v46 = vsel %vm2789_vm6, %v5625_v3, 0.0 }
 0xc49   :  { %v2832_v44 = vmul.f32 1.442695, %v2819_v43 }
 0xc4a   :  { %4989 = vrot.lane.b32.xlu1 %v5534_v13, %s5143_s2  ;;  %v2810_v39 = vpop.xlane.xlu0 %2809 }
 0xc4b   :  { %v2820_v5 = vsub.f32 %v2787_v6, %v2810_v39 }
 0xc4d   :  { %v2834_v41 = vmul.f32 1.442695, %v2820_v5 }
 0xc4e   :  { %4999 = vrot.lane.b32.xlu1 %v5559_v24, %s5143_s2  ;;  %v2813_v8 = vpop.xlane.xlu1 %2812  ;;  %v2840_v23 = vpop.xlane.xlu0 %2839 }
 0xc4f   :  { %5059 = vpow2.f32 %v2834_v41  ;;  %v2821_v45 = vsub.f32 %v2788_v11, %v2813_v8 }
 0xc50   :  { %5061 = vpow2.f32 %v2832_v44 }
 0xc51   :  { %v2836_v13 = vmul.f32 1.442695, %v2821_v45 }
 0xc53   :  { %5063 = vpow2.f32 %v2836_v13 }
 0xc54   :  { %5065 = vrcp.f32 %v2840_v23 }
 0xc59   :  { %v5629_v24 = vpop.eup %5059 }
 0xc5a   :  { %v2856_v47 = vsel %vm2789_vm6, %v5629_v24, 0.0  ;;  %v5633_v48 = vpop.eup %5061 }
 0xc5b   :  { %v2853_v49 = vsel %vm2789_vm6, %v5633_v48, 0.0 }
 0xc5d   :  { %v5637_v50 = vpop.eup %5063 }
 0xc5e   :  { %v2859_v20 = vsel %vm2789_vm6, %v5637_v50, 0.0 }
 0xc65   :  { %2851 = vadd.xlane.f32.xlu0 %v2850_v46 }
 0xc69   :  { %2857 = vadd.xlane.f32.xlu0 %v2856_v47 }
 0xc72   :  { %2854 = vadd.xlane.f32.xlu1 %v2853_v49 }
 0xc76   :  { %2860 = vadd.xlane.f32.xlu1 %v2859_v20 }
 0xc7f   :  { %5004 = vrot.lane.b32.xlu0 %v5563_v28, %s5143_s2  ;;  %v5066_v28 = vpop.eup %5065 }
 0xc87   :  { %5009 = vrot.lane.b32.xlu1 %v5570_v21, %s5143_s2  ;;  %v2870_v21 = vmul.f32 %v5066_v28, %v5596_v9 }
 0xcb6   :  { %v2843_v51 = vpop.xlane.xlu1 %2842 }
 0xcb7   :  { %5067 = vrcp.f32 %v2843_v51 }
 0xcb9   :  { %v2846_v52 = vpop.xlane.xlu0 %2845 }
 0xcba   :  { %5069 = vrcp.f32 %v2846_v52 }
 0xcbd   :  { %v4975_v53 = vpop.permute.xlu0 %4974 }
 0xcbe   :  { %v2849_v54 = vpop.xlane.xlu1 %2848  ;;  %v4977_v55 = vunpack.i.h.bf16 %v4975_v53  ;;  %v4976_v57 = vunpack.i.l.bf16 %v4975_v53 }
 0xcbf   :  { %5071 = vrcp.f32 %v2849_v54 }
 0xcc0   :  { %v4847_v59 = vpack.c.bf16 %v4977_v55, %v4976_v57  ;;  %v54_v57 = vld [vmem:[#allocation2 + $0x20] sm:$0xff] }
 0xcc1   :  { %v5068_v63 = vpop.eup %5067  ;;  %v4995_v6 = vpop.permute.xlu0 %4994  ;;  %v4879_v28 = vpack.c.bf16 %v55_v58, %v54_v57  ;;  %v62_v57 = vld [vmem:[%s5833_s3] sm:$0xff]  ;;  %v63_v58 = vld [vmem:[%s5833_s3 + $0x8] sm:$0xff] }
 0xcc2   :  { %v4980_v60 = vpop.permute.xlu1 %4979  ;;  %4849 = vmatpush3.bf16.msk.msra.mxu0 %vm5645_vm9, %v4847_v59  ;;  %v2871_v9 = vmul.f32 %v5068_v63, %v5601_v30  ;;  %v4997_v14 = vunpack.i.h.bf16 %v4995_v6  ;;  %v4996_v15 = vunpack.i.l.bf16 %v4995_v6 }
 0xcc3   :  { %v4982_v61 = vunpack.i.h.bf16 %v4980_v60  ;;  %v4981_v62 = vunpack.i.l.bf16 %v4980_v60  ;;  %4854 = vmatprep.subr.bf16.mxu0 %v5140_v0  ;;  %v56_v60 = vld [vmem:[#allocation2 + $0x80] sm:$0xff] }
 0xcc4   :  { %v5070_v11 = vpop.eup %5069  ;;  %v4863_v27 = vpack.c.bf16 %v4997_v14, %v4996_v15 }
 0xcc5   :  { %v4851_v4 = vpack.c.bf16 %v4982_v61, %v4981_v62  ;;  %4629 = vmatmul.mubr.msk.f32.vlgmr.msra.gmra.mrb[30].mxu0 %vm2789_vm6, %v2870_v21  ;;  %v2872_v25 = vmul.f32 %v5070_v11, %v5605_v33  ;;  %v57_v21 = vld [vmem:[#allocation2 + $0xb0] sm:$0xff] }
 0xcc6   :  { %v4985_v7 = vpop.permute.xlu1 %4984  ;;  %4642 = vmatprep.mubr.msk.f32.mxu0 %vm5141_vm0, %v5142_v1  ;;  %v4882_v61 = vpack.c.bf16 %v57_v21, %v56_v60  ;;  %v66_v21 = vld [vmem:[%s5833_s3 + $0x20] sm:$0xff] }
 0xcc7   :  { %v4987_v2 = vunpack.i.h.bf16 %v4985_v7  ;;  %v4986_v10 = vunpack.i.l.bf16 %v4985_v7  ;;  %4853 = vmatpush3.bf16.msk.msra.mxu1 %vm5645_vm9, %v4851_v4 }
 0xcc8   :  { %4858 = vmatprep.subr.bf16.mxu1 %v5140_v0 }
 0xcc9   :  { %v4855_v16 = vpack.c.bf16 %v4987_v2, %v4986_v10  ;;  %v5072_v26 = vpop.eup %5071 }
 0xcca   :  { %v4990_v17 = vpop.permute.xlu1 %4989  ;;  %4636 = vmatmul.mubr.msk.f32.vlgmr.msra.gmra.mrb[34].mxu1 %vm2789_vm6, %v2871_v9  ;;  %v2873_v32 = vmul.f32 %v5072_v26, %v5609_v35 }
 0xccb   :  { %v4992_v18 = vunpack.i.h.bf16 %v4990_v17  ;;  %v4991_v22 = vunpack.i.l.bf16 %v4990_v17  ;;  %4857 = vmatpush3.bf16.msk.msra.mxu0 %vm5645_vm9, %v4855_v16  ;;  %4649 = vmatprep.mubr.msk.f32.mxu1 %vm5141_vm0, %v5142_v1 }
 0xccc   :  { %4862 = vmatprep.subr.bf16.mxu0 %v5140_v0 }
 0xccd   :  { %v4859_v12 = vpack.c.bf16 %v4992_v18, %v4991_v22 }
 0xcce   :  { %v5000_v29 = vpop.permute.xlu1 %4999  ;;  %4643 = vmatmul.mubr.msk.f32.vlgmr.msra.gmra.mrb[32].mxu0 %vm2789_vm6, %v2872_v25 }
 0xccf   :  { %v5002_v19 = vunpack.i.h.bf16 %v5000_v29  ;;  %v5001_v30 = vunpack.i.l.bf16 %v5000_v29  ;;  %4861 = vmatpush3.bf16.msk.msra.mxu1 %vm5645_vm9, %v4859_v12  ;;  %4865 = vmatpush3.bf16.msk.msra.mxu0 %vm5645_vm9, %v4863_v27  ;;  %v4228_v12 = vld [vmem:[%s5834_s4 + $0x4] ss:$0 sm:$0xff] }
 0xcd0   :  { %4866 = vmatprep.subr.bf16.mxu1 %v5140_v0  ;;  %4656 = vmatprep.mubr.msk.f32.mxu0 %vm5141_vm0, %v5142_v1 }
 0xcd1   :  { %v4867_v33 = vpack.c.bf16 %v5002_v19, %v5001_v30  ;;  %4870 = vmatprep.subr.bf16.mxu0 %v5140_v0 }
 0xcd2   :  { %4650 = vmatmul.mubr.msk.f32.vlgmr.msra.gmra.mrb[36].mxu1 %vm2789_vm6, %v2873_v32 }
 0xcd3   :  { %4869 = vmatpush3.bf16.msk.msra.mxu1 %vm5645_vm9, %v4867_v33  ;;  %4663 = vmatprep.mubr.msk.f32.mxu1 %vm5141_vm0, %v5142_v1 }
 0xcd4   :  { %4874 = vmatprep.subr.bf16.mxu1 %v5140_v0 }
 0xcf2   :  { %v2852_v34 = vpop.xlane.xlu0 %2851 }
 0xcf3   :  { %5073 = vrcp.f32 %v2852_v34 }
 0xcf6   :  { %v2858_v35 = vpop.xlane.xlu0 %2857 }
 0xcf7   :  { %5075 = vrcp.f32 %v2858_v35 }
 0xcfa   :  { %v5005_v36 = vpop.permute.xlu0 %5004 }
 0xcfb   :  { %v5007_v37 = vunpack.i.h.bf16 %v5005_v36  ;;  %v5006_v38 = vunpack.i.l.bf16 %v5005_v36 }
 0xcfd   :  { %v5074_v39 = vpop.eup %5073  ;;  %v4871_v40 = vpack.c.bf16 %v5007_v37, %v5006_v38 }
 0xcfe   :  { %v2874_v5 = vmul.f32 %v5074_v39, %v5625_v3  ;;  %v5738_v39 = vld [vmem:[%s5834_s4 + $0x9] ss:$0 sm:$0xff] }
 0xcff   :  { %v2855_v41 = vpop.xlane.xlu1 %2854 }
 0xd00   :  { %5077 = vrcp.f32 %v2855_v41  ;;  %4657 = vmatmul.mubr.msk.f32.vlgmr.msra.gmra.mrb[34].mxu0 %vm2789_vm6, %v2874_v5 }
 0xd01   :  { %v5076_v56 = vpop.eup %5075  ;;  %4873 = vmatpush3.bf16.msk.msra.mxu0 %vm5645_vm9, %v4871_v40  ;;  %4670 = vmatprep.mubr.msk.f32.mxu0 %vm5141_vm0, %v5142_v1 }
 0xd02   :  { %v2876_v43 = vmul.f32 %v5076_v56, %v5629_v24  ;;  %4878 = vmatprep.subr.bf16.mxu0 %v5140_v0 }
 0xd03   :  { %v2861_v8 = vpop.xlane.xlu1 %2860 }
 0xd04   :  { %5079 = vrcp.f32 %v2861_v8  ;;  %4671 = vmatmul.mubr.msk.f32.vlgmr.msra.gmra.mrb[36].mxu0 %vm2789_vm6, %v2876_v43 }
 0xd05   :  { %4688 = vmatprep.mubr.msk.f32.mxu0 %vm5141_vm0, %v5142_v1  ;;  %4880 = vmatpush3.bf16.msra.mxu0 %v4879_v28 }
 0xd06   :  { %4881 = vmatprep.subr.bf16.mxu0 %v5140_v0 }
 0xd07   :  { %v5010_v44 = vpop.permute.xlu1 %5009 }
 0xd08   :  { %v5012_v45 = vunpack.i.h.bf16 %v5010_v44  ;;  %v5011_v3 = vunpack.i.l.bf16 %v5010_v44 }
 0xd09   :  { %4883 = vmatpush3.bf16.msra.mxu0 %v4882_v61 }
 0xd0a   :  { %v5078_v13 = vpop.eup %5077  ;;  %v4875_v46 = vpack.c.bf16 %v5012_v45, %v5011_v3  ;;  %4890 = vmatprep.subr.bf16.mxu0 %v5140_v0  ;;  %v4230_v3 = vld [vmem:[%s5834_s4 + $0xa] ss:$0 sm:$0xff] }
 0xd0b   :  { %v2875_v47 = vmul.f32 %v5078_v13, %v5633_v48 }
 0xd0d   :  { %4664 = vmatmul.mubr.msk.f32.vlgmr.msra.gmra.mrb[38].mxu1 %vm2789_vm6, %v2875_v47 }
 0xd0e   :  { %v5080_v49 = vpop.eup %5079  ;;  %4877 = vmatpush3.bf16.msk.msra.mxu1 %vm5645_vm9, %v4875_v46  ;;  %4677 = vmatprep.mubr.msk.f32.mxu1 %vm5141_vm0, %v5142_v1 }
 0xd0f   :  { %v2877_v24 = vmul.f32 %v5080_v49, %v5637_v50  ;;  %4884 = vmatprep.subr.bf16.mxu1 %v5140_v0 }
 0xd11   :  { %4678 = vmatmul.mubr.msk.f32.vlgmr.msra.gmra.mrb[40].mxu1 %vm2789_vm6, %v2877_v24  ;;  %v58_v24 = vld [vmem:[#allocation2 + $0x28] sm:$0xff] }
 0xd12   :  { %4699 = vmatprep.mubr.msk.f32.mxu1 %vm5141_vm0, %v5142_v1  ;;  %4886 = vmatpush3.bf16.msra.mxu1 %v4879_v28  ;;  %v64_v28 = vld [vmem:[%s5833_s3 + $0x10] sm:$0xff] }
 0xd13   :  { %4887 = vmatprep.subr.bf16.mxu1 %v5140_v0 }
 0xd16   :  { %4889 = vmatpush3.bf16.msra.mxu1 %v4882_v61  ;;  %v67_v61 = vld [vmem:[%s5833_s3 + $0x28] sm:$0xff] }
 0xd17   :  { %4896 = vmatprep.subr.bf16.mxu1 %v5140_v0 }
 0xd98   :  { %v2955_v20 = vpop.f32.mrb[30].mxu0 }
 0xd99   :  { %v4630_v48 = vpop.f32.mrb[31].mxu0 }
 0xd9d   :  { %v3035_v23 = vpop.f32.mrb[34].mxu1 }
 0xd9e   :  { %v4637_v51 = vpop.f32.mrb[35].mxu1 }
 0xd9f   :  { %v61_v51 = vld [vmem:[#allocation2 + $0xb8] sm:$0xff] }
 0xda1   :  { %v3115_v52 = vpop.f32.mrb[32].mxu0 }
 0xda2   :  { %v4644_v53 = vpop.f32.mrb[33].mxu0 }
 0xda5   :  { %v3195_v54 = vpop.f32.mrb[36].mxu1 }
 0xda6   :  { %v4651_v55 = vpop.f32.mrb[37].mxu1 }
 0xdd3   :  { %v3275_v50 = vpop.f32.mrb[34].mxu0 }
 0xdd4   :  { %v4658_v59 = vpop.f32.mrb[35].mxu0 }
 0xdd5   :  { %v65_v59 = vld [vmem:[%s5833_s3 + $0x18] sm:$0xff] }
 0xdd6   :  { %v4900_v60 = vpack.c.bf16 %v65_v59, %v64_v28 }
 0xdd7   :  { %v3435_v62 = vpop.f32.mrb[36].mxu0 }
 0xdd8   :  { %3539 = vrot.lane.b32.xlu1 %v3435_v62, %s5148_s14  ;;  %v4672_v63 = vpop.f32.mrb[37].mxu0 }
 0xddc   :  { %3520 = vrot.lane.b32.xlu1 %v3035_v23, %s5149_s15  ;;  %v60_v23 = vld [vmem:[#allocation2 + $0x88] sm:$0xff] }
 0xde0   :  { %v3355_v4 = vpop.f32.mrb[38].mxu1  ;;  %3528 = vrot.lane.b32.xlu1 %v3195_v54, %s5150_s16 }
 0xde1   :  { %v4665_v6 = vpop.f32.mrb[39].mxu1  ;;  %3535 = vrot.lane.b32.xlu0 %v3355_v4, %s5149_s15 }
 0xde2   :  { %v4903_v6 = vpack.c.bf16 %v67_v61, %v66_v21 }
 0xde4   :  { %v3515_v7 = vpop.f32.mrb[40].mxu1  ;;  %3730 = vrot.lane.b32.xlu1 %v4228_v12, %s5151_s19 }
 0xde5   :  { %v4679_v2 = vpop.f32.mrb[41].mxu1  ;;  %3543 = vrot.lane.b32.xlu0 %v3515_v7, %s5150_s16 }
 0xde9   :  { %3524 = vrot.lane.b32.xlu0 %v3115_v52, %s5148_s14  ;;  %v4894_v52 = vpack.c.bf16 %v61_v51, %v60_v23 }
 0xe4a   :  { %v3540_v10 = vpop.permute.xlu1 %3539 }
 0xe4e   :  { %v3521_v14 = vpop.permute.xlu1 %3520 }
 0xe4f   :  { %v3531_v18 = vsel %vm251_vm2, %v2955_v20, %v3521_v14  ;;  %v59_v20 = vld [vmem:[#allocation2 + $0x58] sm:$0xff] }
 0xe50   :  { %v4891_v48 = vpack.c.bf16 %v59_v20, %v58_v24 }
 0xe52   :  { %v3529_v25 = vpop.permute.xlu1 %3528 }
 0xe53   :  { %v3536_v9 = vpop.permute.xlu0 %3535 }
 0xe54   :  { %v3546_v11 = vsel %vm251_vm2, %v3275_v50, %v3536_v9  ;;  %v4897_v50 = vpack.c.bf16 %v63_v58, %v62_v57 }
 0xe55   :  { %v3547_v16 = vsel %vm1575_vm3, %v3546_v11, %v3540_v10 }
 0xe56   :  { %v3731_v34 = vpop.permute.xlu1 %3730 }
 0xe57   :  { %v3544_v15 = vpop.permute.xlu0 %3543 }
 0xe58   :  { %v3548_v17 = vsel %vm1577_vm4, %v3547_v16, %v3544_v15 }
 0xe59   :  { %4700 = vmatmul.mubr.msk.f32.vlgmr.msra.gmra.mrb[42].mxu1 %vm87_vm1, %v3548_v17 }
 0xe5a   :  { %4729 = vmatprep.mubr.msk.f32.mxu1 %vm5141_vm0, %v5142_v1  ;;  %4898 = vmatpush3.bf16.msra.mxu1 %v4897_v50 }
 0xe5b   :  { %v3525_v22 = vpop.permute.xlu0 %3524  ;;  %4899 = vmatprep.subr.bf16.mxu1 %v5140_v0 }
 0xe5c   :  { %v3532_v26 = vsel %vm1575_vm3, %v3531_v18, %v3525_v22 }
 0xe5d   :  { %v3533_v27 = vsel %vm1577_vm4, %v3532_v26, %v3529_v25  ;;  %v68_v25 = vld [vmem:[%s5833_s3 + $0x30] sm:$0xff]  ;;  %v69_v26 = vld [vmem:[%s5833_s3 + $0x38] sm:$0xff] }
 0xe5e   :  { %4689 = vmatmul.mubr.msk.f32.vlgmr.msra.gmra.mrb[38].mxu0 %vm87_vm1, %v3533_v27  ;;  %4901 = vmatpush3.bf16.msra.mxu1 %v4900_v60  ;;  %v4906_v27 = vpack.c.bf16 %v69_v26, %v68_v25 }
 0xe5f   :  { %4710 = vmatprep.mubr.msk.f32.mxu0 %vm5141_vm0, %v5142_v1  ;;  %4892 = vmatpush3.bf16.msra.mxu0 %v4891_v48 }
 0xe60   :  { %4893 = vmatprep.subr.bf16.mxu0 %v5140_v0  ;;  %4902 = vmatprep.subr.bf16.mxu1 %v5140_v0 }
 0xe62   :  { %4904 = vmatpush3.bf16.msra.mxu1 %v4903_v6 }
 0xe63   :  { %4895 = vmatpush3.bf16.msra.mxu0 %v4894_v52  ;;  %4905 = vmatprep.subr.bf16.mxu1 %v5140_v0 }
 0xe64   :  { %4908 = vmatprep.subr.bf16.mxu0 %v5140_v0 }
 0xe66   :  { %4907 = vmatpush3.bf16.msra.mxu1 %v4906_v27 }
 0xf2c   :  { %v3720_v29 = vpop.f32.mrb[42].mxu1 }
 0xf2d   :  { %3725 = vrot.lane.b32.xlu0 %v3720_v29, %s5151_s19  ;;  %v4701_v19 = vpop.f32.mrb[43].mxu1 }
 0xf31   :  { %v3618_v30 = vpop.f32.mrb[38].mxu0 }
 0xf32   :  { %v4690_v32 = vpop.f32.mrb[39].mxu0 }
 0xf9f   :  { %v3726_v33 = vpop.permute.xlu0 %3725 }
 0xfa0   :  { %v3728_v35 = vadd.f32 %v3726_v33, %v5456_v31  ;;  %v3622_v31 = vadd.f32 %v3618_v30, %v5468_v42 }
 0xfa2   :  { %v3733_v36 = vadd.f32 %v3731_v34, %v3728_v35  ;;  %v3627_v43 = vadd.f32 %v4228_v12, %v3622_v31  ;;  %v4234_v35 = vld [vmem:[%s5834_s4 + $0x6] ss:$0 sm:$0xff] }
 0xfa4   :  { %3735 = vrot.lane.b32.xlu0 %v3733_v36, %s5143_s2  ;;  %v3628_v8 = vsel %vm87_vm1, %v3627_v43, 0.0 }
0x1016   :  { %v3736_v37 = vpop.permute.xlu0 %3735 }
0x1017   :  { %v3738_v38 = vsel %vm87_vm1, %v3736_v37, 0.0 }
0x1018   :  { %3739 = vadd.xlane.f32.xlu1 %v3738_v38 }
0x1029   :  { %3756 = vrot.lane.b32.xlu1 %v5738_v39, %s5151_s19 }
0x10a5   :  { %v3740_v40 = vpop.xlane.xlu1 %3739 }
0x10a6   :  { %v3741_v5 = vmul.f32 0.03125, %v3740_v40 }
0x10a8   :  { %v3742_v41 = vsub.f32 %v3733_v36, %v3741_v5 }
0x10a9   :  { %v3757_v63 = vpop.permute.xlu1 %3756 }
0x10aa   :  { %v3743_v56 = vmul.f32 %v3742_v41, %v3742_v41 }
0x10ac   :  { %3745 = vrot.lane.b32.xlu0 %v3743_v56, %s5143_s2 }
0x10cb   :  { %3629 = vadd.xlane.f32.xlu0 %v3628_v8 }
0x111e   :  { %v3746_v44 = vpop.permute.xlu0 %3745 }
0x111f   :  { %v3748_v45 = vsel %vm87_vm1, %v3746_v44, 0.0 }
0x1120   :  { %3749 = vadd.xlane.f32.xlu0 %v3748_v45 }
0x1136   :  { %3761 = vrot.lane.b32.xlu0 %v4230_v3, %s5151_s19 }
0x1158   :  { %v3630_v13 = vpop.xlane.xlu0 %3629 }
0x1159   :  { %v3631_v46 = vmul.f32 0.03125, %v3630_v13 }
0x115b   :  { %v3632_v47 = vsub.f32 %v3627_v43, %v3631_v46 }
0x115d   :  { %v3633_v49 = vmul.f32 %v3632_v47, %v3632_v47 }
0x115f   :  { %v3634_v42 = vsel %vm87_vm1, %v3633_v49, 0.0 }
0x1160   :  { %3635 = vadd.xlane.f32.xlu1 %v3634_v42 }
0x11ad   :  { %v3750_v53 = vpop.xlane.xlu0 %3749 }
0x11ae   :  { %v3751_v54 = vmul.f32 0.03125, %v3750_v53 }
0x11b0   :  { %v3752_v55 = vadd.f32 1e-05, %v3751_v54 }
0x11b1   :  { %v3762_v7 = vpop.permute.xlu0 %3761 }
0x11b2   :  { %5081 = vrsqrt.f32 %v3752_v55 }
0x11bc   :  { %v5082_v62 = vpop.eup %5081 }
0x11bd   :  { %v3754_v4 = vmul.f32 %v5082_v62, %v3742_v41 }
0x11bf   :  { %v3759_v2 = vmul.f32 %v3757_v63, %v3754_v4 }
0x11c1   :  { %v3764_v10 = vadd.f32 %v3762_v7, %v3759_v2 }
0x11c3   :  { %3946 = vrot.lane.b32.xlu0 %v3764_v10, %s5143_s2 }
0x11ed   :  { %v3636_v9 = vpop.xlane.xlu1 %3635 }
0x11ee   :  { %v3637_v11 = vmul.f32 0.03125, %v3636_v9 }
0x11f0   :  { %v3638_v14 = vadd.f32 1e-05, %v3637_v11 }
0x11f2   :  { %5083 = vrsqrt.f32 %v3638_v14 }
0x11fc   :  { %v5084_v15 = vpop.eup %5083 }
0x11fd   :  { %v3640_v16 = vmul.f32 %v5084_v15, %v3632_v47 }
0x11ff   :  { %v3645_v17 = vmul.f32 %v5738_v39, %v3640_v16 }
0x1201   :  { %v3650_v18 = vadd.f32 %v4230_v3, %v3645_v17 }
0x1203   :  { %4711 = vmatmul.mubr.msk.f32.vlgmr.msra.gmra.mrb[40].mxu0 %vm87_vm1, %v3650_v18 }
0x1204   :  { %4910 = vmatpush3.bf16.msra.mxu0 %v4891_v48  ;;  %4740 = vmatprep.mubr.msk.f32.mxu0 %vm5141_vm0, %v5142_v1  ;;  %v4236_v48 = vld [vmem:[%s5834_s4 + $0xb] ss:$0 sm:$0xff] }
0x1205   :  { %4911 = vmatprep.subr.bf16.mxu0 %v5140_v0 }
0x1208   :  { %4913 = vmatpush3.bf16.msra.mxu0 %v4894_v52  ;;  %v4237_v52 = vld [vmem:[%s5834_s4 + $0xc] ss:$0 sm:$0xff] }
0x1209   :  { %4914 = vmatprep.subr.bf16.mxu0 %v5140_v0 }
0x1235   :  { %v3947_v22 = vpop.permute.xlu0 %3946 }
0x1236   :  { %4741 = vmatmul.mubr.msk.f32.vlgmr.msra.gmra.mrb[42].mxu0 %vm87_vm1, %v3947_v22 }
0x1237   :  { %4916 = vmatpush3.bf16.msra.mxu0 %v4897_v50  ;;  %4759 = vmatprep.mubr.msk.f32.mxu0 %vm5141_vm0, %v5142_v1  ;;  %v4232_v1 = vld [vmem:[%s5834_s4 + $0x5] ss:$0 sm:$0xff] }
0x1238   :  { %4917 = vmatprep.subr.bf16.mxu0 %v5140_v0 }
0x123b   :  { %4919 = vmatpush3.bf16.msra.mxu0 %v4900_v60 }
0x123c   :  { %4920 = vmatprep.subr.bf16.mxu0 %v5140_v0 }
0x123f   :  { %4922 = vmatpush3.bf16.msra.mxu0 %v4903_v6 }
0x1240   :  { %4923 = vmatprep.subr.bf16.mxu0 %v5140_v0 }
0x1243   :  { %4925 = vmatpush3.bf16.msra.mxu0 %v4906_v27 }
0x12d6   :  { %v3838_v12 = vpop.f32.mrb[40].mxu0 }
0x12d7   :  { %v3839_v29 = vadd.f32 %v4232_v1, %v3838_v12  ;;  %v4712_v19 = vpop.f32.mrb[41].mxu0 }
0x12d9   :  { %v3842_v0 = vmax.f32 %v3839_v29, 0.0 }
0x12db   :  { %4730 = vmatmul.mubr.msk.f32.vlgmr.msra.gmra.mrb[44].mxu1 %vm3847_vm10, %v3842_v0 }
0x1309   :  { %v4016_v30 = vpop.f32.mrb[42].mxu0 }
0x130a   :  { %v4017_v32 = vadd.f32 %v4232_v1, %v4016_v30  ;;  %v4742_v33 = vpop.f32.mrb[43].mxu0 }
0x130c   :  { %v4020_v34 = vmax.f32 %v4017_v32, 0.0 }
0x130e   :  { %4760 = vmatmul.mubr.msk.f32.vlgmr.msra.gmra.mrb[44].mxu0 %vm3847_vm10, %v4020_v34 }
0x13ae   :  { %v3917_v36 = vpop.f32.mrb[44].mxu1 }
0x13af   :  { %v3918_v37 = vadd.f32 %v4234_v35, %v3917_v36  ;;  %v4731_v38 = vpop.f32.mrb[45].mxu1 }
0x13b1   :  { %v3921_v39 = vadd.f32 %v3918_v37, %v3650_v18 }
0x13b3   :  { %v3922_v40 = vsel %vm87_vm1, %v3921_v39, 0.0 }
0x13b4   :  { %3923 = vadd.xlane.f32.xlu1 %v3922_v40 }
0x13e1   :  { %v4090_v5 = vpop.f32.mrb[44].mxu0 }
0x13e2   :  { %v4091_v41 = vadd.f32 %v4234_v35, %v4090_v5  ;;  %v4761_v56 = vpop.f32.mrb[45].mxu0 }
0x13e4   :  { %4095 = vrot.lane.b32.xlu0 %v4091_v41, %s5151_s19 }
0x1441   :  { %v3924_v8 = vpop.xlane.xlu1 %3923 }
0x1442   :  { %v3925_v44 = vmul.f32 0.03125, %v3924_v8 }
0x1444   :  { %v3926_v45 = vsub.f32 %v3921_v39, %v3925_v44 }
0x1446   :  { %v3927_v46 = vmul.f32 %v3926_v45, %v3926_v45 }
0x1448   :  { %v3928_v47 = vsel %vm87_vm1, %v3927_v46, 0.0 }
0x1456   :  { %v4096_v31 = vpop.permute.xlu0 %4095 }
0x1457   :  { %v4098_v43 = vadd.f32 %v4096_v31, %v3764_v10 }
0x1459   :  { %4100 = vrot.lane.b32.xlu0 %v4098_v43, %s5143_s2 }
0x14cb   :  { %v4101_v3 = vpop.permute.xlu0 %4100 }
0x14cc   :  { %v4103_v13 = vsel %vm87_vm1, %v4101_v3, 0.0 }
0x14cd   :  { %4104 = vadd.xlane.f32.xlu0 %v4103_v13 }
0x14d1   :  { %3929 = vadd.xlane.f32.xlu0 %v3928_v47 }
0x155a   :  { %v4105_v49 = vpop.xlane.xlu0 %4104 }
0x155b   :  { %v4106_v42 = vmul.f32 0.03125, %v4105_v49 }
0x155d   :  { %v4107_v24 = vsub.f32 %v4098_v43, %v4106_v42 }
0x155e   :  { %v3930_v53 = vpop.xlane.xlu0 %3929 }
0x155f   :  { %v4108_v20 = vmul.f32 %v4107_v24, %v4107_v24  ;;  %v3931_v54 = vmul.f32 0.03125, %v3930_v53 }
0x1561   :  { %4110 = vrot.lane.b32.xlu1 %v4108_v20, %s5143_s2  ;;  %v3932_v55 = vadd.f32 1e-05, %v3931_v54  ;;  %s5153_s2 = smov [#allocation5]  }
0x1562   :  { %s4138_s4 = sshll.u32 %s5153_s2, 4  ;;  %s4139_s4 = int_to_ptr.vmem [resolvable:$true] %s4138_s4 }
0x1563   :  { %5085 = vrsqrt.f32 %v3932_v55  ;;  %p5116_p9 = scmp.lt.s32.totalorder %s4139_s4, %s4139_s4 }
0x1565   :  { %4121 = vrot.lane.b32.xlu1 %v4236_v48, %s5151_s19 }
0x156d   :  { %v5086_v50 = vpop.eup %5085 }
0x156e   :  { %v3934_v59 = vmul.f32 %v5086_v50, %v3926_v45 }
0x1570   :  { %v3939_v61 = vmul.f32 %v4236_v48, %v3934_v59 }
0x1572   :  { %v3944_v6 = vadd.f32 %v4237_v52, %v3939_v61 }
0x15d3   :  { %v4111_v23 = vpop.permute.xlu1 %4110 }
0x15d4   :  { %v4113_v51 = vsel %vm87_vm1, %v4111_v23, 0.0 }
0x15d5   :  { %4114 = vadd.xlane.f32.xlu0 %v4113_v51 }
0x15d7   :  { %v4122_v21 = vpop.permute.xlu1 %4121 }
0x15eb   :  { %4126 = vrot.lane.b32.xlu0 %v4237_v52, %s5151_s19  ;;  %s5111_s19 = scalar_lea.vmem %s4139_s4, 128 }
0x15ec   :  { %p5112_p8 = scmp.ne.s32.totalorder %s4139_s4, %s5111_s19  ;;  %p5117_p10 = scmp.lt.s32.totalorder %s5111_s19, %s5111_s19 }
0x15ee   :  { %p5118_p11 = por %p5117_p10, %p5116_p9 }
0x15f0   :  { %p5119_p12 = pnand %p5118_p11, %p5112_p8 }
0x1662   :  { %v4115_v57 = vpop.xlane.xlu0 %4114 }
0x1663   :  { %v4116_v58 = vmul.f32 0.03125, %v4115_v57 }
0x1665   :  { %v4117_v28 = vadd.f32 1e-05, %v4116_v58 }
0x1666   :  { %v4127_v63 = vpop.permute.xlu0 %4126 }
0x1667   :  { %5087 = vrsqrt.f32 %v4117_v28 }
0x1671   :  { %v5088_v60 = vpop.eup %5087 }
0x1672   :  { %v4119_v62 = vmul.f32 %v5088_v60, %v4107_v24 }
0x1674   :  { %v4124_v4 = vmul.f32 %v4122_v21, %v4119_v62 }
0x1676   :  { %v4129_v7 = vadd.f32 %v4127_v63, %v4124_v4 }
0x1678   :  { %v4130_v2 = vsel %vm87_vm1, %v3944_v6, %v4129_v7 }
0x1679   :  { %4131 = vst.msk [vmem:[#allocation5] sm:$0xff] %vm3847_vm10, %v4130_v2 }
0x167a   :  { %5122 = shalt.err (!%p5119_p12)
}
0x167b   :  { %s5123_s10 = scalar_lea.hbm %s5835_s5, 128 }
0x167c   :  { %p5124_p13 = scmp.ne.s32.totalorder %s5835_s5, %s5123_s10  ;;  %p5127_p0 = scmp.lt.u32.totalorder %s5123_s10, %s5835_s5 }
0x167e   :  { %p5129_p1 = pnand %p5127_p0, %p5124_p13 }
0x1680   :  { %5132 = shalt.err (!%p5129_p1)
}
0x1681   :  { %4141 = dma.vmem_to_hbm [thread:$0]  %s4139_s4, 128, %s5835_s5, [#allocation4]  }
0x1682   :  { %5135 = dma.done.wait [#allocation4], 128  }
0x1683   :  { %5136 = vsyncadd [#allocation4], 4294967168 }
0x1684   :  { %4145 = vsyncpa [#allocation3], 1 }
0x1685   :  { %4146 = vsyncpa [#allocation4], 1 }

</bundles_post_ra>
